<compile_context>
chip_gen: v7x
topology: tpu7x:2x2x1
jax: 0.10.0
libtpu: 0.0.40
codegen_flags: <defaults>
</compile_context>

<pallas_src>
import jax
import jax.numpy as jnp
from jax import lax
from jax.experimental import pallas as pl
from jax.experimental.pallas import tpu as pltpu

Z_DIM = 512
N_CLASSES = 48
GROUP = 16            # hidden reshaped to (N_CLASSES, GROUP)
HIDDEN = 64
LN_EPS = 1e-5         # torch.nn.LayerNorm default

# 128-lane-aligned offsets inside the packed parameter slab (1, SLAB_W).
OFF_B1, OFF_B2, OFF_B3 = 0, 128, 896
OFF_G1, OFF_BE1 = 1024, 1152
OFF_G2, OFF_BE2 = 1280, 1408
SLAB_W = 1536


# ---------------------------------------------------------------------------
# Fused kernel:
#   h1 = z @ w1 + b1                      (1, 48)
#   h2 = h1 @ w2 + b2                     (1, 768)
#   h  = reshape(h2, (48, 16))            via VMEM scratch row copies
#   h  = LayerNorm16(h) * g1 + be1
#   y  = h @ w3 + b3                      (48, 64)
#   o  = LayerNorm64(y) * g2 + be2
# ---------------------------------------------------------------------------
def hypernet_kernel(z_ref, w1_ref, w2_ref, w3_ref, slab_ref, o_ref,
                    h2_s, hs_s):
    # Unpack the small-parameter slab (all reads are 128-lane aligned).
    b1 = slab_ref[:, OFF_B1:OFF_B1 + N_CLASSES]            # (1, 48)
    b2 = slab_ref[:, OFF_B2:OFF_B2 + N_CLASSES * GROUP]    # (1, 768)
    b3 = slab_ref[:, OFF_B3:OFF_B3 + HIDDEN]               # (1, 64)
    g1 = slab_ref[:, OFF_G1:OFF_G1 + GROUP]                # (1, 16)
    be1 = slab_ref[:, OFF_BE1:OFF_BE1 + GROUP]             # (1, 16)
    g2 = slab_ref[:, OFF_G2:OFF_G2 + HIDDEN]               # (1, 64)
    be2 = slab_ref[:, OFF_BE2:OFF_BE2 + HIDDEN]            # (1, 64)

    # --- two dense layers (f32 accumulation on the MXU) --------------------
    h1 = jnp.dot(z_ref[...], w1_ref[...],
                 preferred_element_type=jnp.float32) + b1            # (1, 48)
    h2 = jnp.dot(h1, w2_ref[...],
                 preferred_element_type=jnp.float32) + b2            # (1, 768)
    h2_s[...] = h2

    # --- in-kernel reshape (1, 768) -> (48, 16) via VMEM scratch ------------
    # Static, fully unrolled strided copies (row c <- lanes [16c, 16c+16)).
    for c in range(N_CLASSES):
        hs_s[pl.ds(c, 1), :] = h2_s[pl.ds(0, 1), pl.ds(GROUP * c, GROUP)]

    x = hs_s[...]                                                    # (48, 16)

    # --- LayerNorm over last dim (16), affine -------------------------------
    mu1 = jnp.mean(x, axis=-1, keepdims=True)
    var1 = jnp.mean((x - mu1) ** 2, axis=-1, keepdims=True)
    xn = (x - mu1) * lax.rsqrt(var1 + LN_EPS) * g1 + be1

    # --- dense (16 -> 64) ----------------------------------------------------
    y = jnp.dot(xn, w3_ref[...],
                preferred_element_type=jnp.float32) + b3             # (48, 64)

    # --- LayerNorm over last dim (64), affine -------------------------------
    mu2 = jnp.mean(y, axis=-1, keepdims=True)
    var2 = jnp.mean((y - mu2) ** 2, axis=-1, keepdims=True)
    o_ref[...] = (y - mu2) * lax.rsqrt(var2 + LN_EPS) * g2 + be2


def _full_spec(shape):
    # Whole-array block, single grid point; block equals full array dims so
    # the (8,128) divisibility rule is satisfied.
    return pl.BlockSpec(shape, lambda: tuple(0 for _ in shape))


def pack_params(params):
    """One-time weight prep: pack the 7 tiny vectors into one aligned slab."""
    w1, b1, w2, b2, w3, b3, g1, be1, g2, be2 = params
    slab = jnp.zeros((1, SLAB_W), jnp.float32)
    slab = slab.at[0, OFF_B1:OFF_B1 + N_CLASSES].set(b1.astype(jnp.float32))
    slab = slab.at[0, OFF_B2:OFF_B2 + N_CLASSES * GROUP].set(
        b2.astype(jnp.float32))
    slab = slab.at[0, OFF_B3:OFF_B3 + HIDDEN].set(b3.astype(jnp.float32))
    slab = slab.at[0, OFF_G1:OFF_G1 + GROUP].set(g1.astype(jnp.float32))
    slab = slab.at[0, OFF_BE1:OFF_BE1 + GROUP].set(be1.astype(jnp.float32))
    slab = slab.at[0, OFF_G2:OFF_G2 + HIDDEN].set(g2.astype(jnp.float32))
    slab = slab.at[0, OFF_BE2:OFF_BE2 + HIDDEN].set(be2.astype(jnp.float32))
    return (w1.astype(jnp.float32), w2.astype(jnp.float32),
            w3.astype(jnp.float32), slab)


@jax.jit
def hypernetwork_layernorm(z, packed):
    """Fused Pallas forward. z: (Z_DIM,) f32 -> (N_CLASSES, HIDDEN) f32."""
    w1, w2, w3, slab = packed
    z2 = z.reshape(1, Z_DIM).astype(jnp.float32)

    return pl.pallas_call(
        hypernet_kernel,
        out_shape=jax.ShapeDtypeStruct((N_CLASSES, HIDDEN), jnp.float32),
        in_specs=[_full_spec(z2.shape), _full_spec(w1.shape),
                  _full_spec(w2.shape), _full_spec(w3.shape),
                  _full_spec(slab.shape)],
        out_specs=_full_spec((N_CLASSES, HIDDEN)),
        scratch_shapes=[
            pltpu.VMEM((1, N_CLASSES * GROUP), jnp.float32),   # h2 (1, 768)
            pltpu.VMEM((N_CLASSES, GROUP), jnp.float32),       # h reshaped
        ],
    )(z2, w1, w2, w3, slab)
    # TODO(synk): if multiple latents are ever evaluated, batch z -> (B, 512)
    # and add a "parallel" grid axis (2nd TensorCore on v7x); with a single
    # latent the kernel is pure launch/DMA latency and a grid only adds cost.


def reference_forward(z, params):
    """Pure-JAX reference mirroring the PyTorch forward exactly."""
    w1, b1, w2, b2, w3, b3, g1, be1, g2, be2 = params

    def ln(x, g, b):
        mu = jnp.mean(x, axis=-1, keepdims=True)
        var = jnp.mean((x - mu) ** 2, axis=-1, keepdims=True)
        return (x - mu) * lax.rsqrt(var + LN_EPS) * g + b

    h1 = jnp.matmul(z, w1) + b1
    h1 = jnp.matmul(h1, w2) + b2
    h1 = h1.reshape(N_CLASSES, GROUP)
    h1 = ln(h1, g1, be1)
    h1 = jnp.matmul(h1, w3) + b3
    k = h1.reshape(N_CLASSES, HIDDEN)
    return ln(k, g2, be2)


def init_params(key):
    """Deterministic init matching the module's shapes: fmod(randn, 1)."""
    ks = jax.random.split(key, 6)
    fmod1 = lambda x: jnp.fmod(x, 1.0)
    w1 = fmod1(jax.random.normal(ks[0], (Z_DIM, N_CLASSES), jnp.float32))
    b1 = fmod1(jax.random.normal(ks[1], (N_CLASSES,), jnp.float32))
    w2 = fmod1(jax.random.normal(ks[2], (N_CLASSES, N_CLASSES * GROUP),
                                 jnp.float32))
    b2 = fmod1(jax.random.normal(ks[3], (N_CLASSES * GROUP,), jnp.float32))
    w3 = fmod1(jax.random.normal(ks[4], (GROUP, HIDDEN), jnp.float32))
    b3 = fmod1(jax.random.normal(ks[5], (HIDDEN,), jnp.float32))
    # nn.LayerNorm default affine params: weight=1, bias=0
    g1, be1 = jnp.ones((GROUP,), jnp.float32), jnp.zeros((GROUP,), jnp.float32)
    g2, be2 = jnp.ones((HIDDEN,), jnp.float32), jnp.zeros((HIDDEN,),
                                                          jnp.float32)
    return (w1, b1, w2, b2, w3, b3, g1, be1, g2, be2)


if __name__ == "__main__":
    key = jax.random.PRNGKey(0)
    pkey, zkey = jax.random.split(key)
    params = init_params(pkey)
    z = jax.random.normal(zkey, (Z_DIM,), jnp.float32)

    packed = jax.block_until_ready(pack_params(params))   # one-time weight prep

    out = hypernetwork_layernorm(z, packed)
    out = jax.block_until_ready(out)

    ref = reference_forward(z, params)
    assert out.shape == (N_CLASSES, HIDDEN), out.shape
    assert jnp.allclose(out, ref, atol=1e-4, rtol=1e-4), float(
        jnp.max(jnp.abs(out - ref)))

    print("KERNEL_OK")
</pallas_src>

<mosaic_0001>
module attributes {stable_mosaic.version = 11 : i64} {
  func.func @hypernet_kernel(%arg0: memref<1x512xf32, #tpu.memory_space<vmem>>, %arg1: memref<512x48xf32, #tpu.memory_space<vmem>>, %arg2: memref<48x768xf32, #tpu.memory_space<vmem>>, %arg3: memref<16x64xf32, #tpu.memory_space<vmem>>, %arg4: memref<1x1536xf32, #tpu.memory_space<vmem>>, %arg5: memref<48x64xf32, #tpu.memory_space<vmem>>, %arg6: memref<1x768xf32, #tpu.memory_space<vmem>>, %arg7: memref<48x16xf32, #tpu.memory_space<vmem>>) attributes {dimension_semantics = [], scalar_prefetch = 0 : i64, scratch_operands = 2 : i64, tpu.core_type = #tpu.core_type<tc>} {
    %c0 = arith.constant 0 : index
    %c0_0 = arith.constant 0 : index
    %0 = vector.load %arg4[%c0, %c0_0] : memref<1x1536xf32, #tpu.memory_space<vmem>>, vector<1x48xf32>
    %c0_1 = arith.constant 0 : index
    %c128 = arith.constant 128 : index
    %1 = vector.load %arg4[%c0_1, %c128] : memref<1x1536xf32, #tpu.memory_space<vmem>>, vector<1x768xf32>
    %c0_2 = arith.constant 0 : index
    %c896 = arith.constant 896 : index
    %2 = vector.load %arg4[%c0_2, %c896] : memref<1x1536xf32, #tpu.memory_space<vmem>>, vector<1x64xf32>
    %c0_3 = arith.constant 0 : index
    %c1024 = arith.constant 1024 : index
    %3 = vector.load %arg4[%c0_3, %c1024] : memref<1x1536xf32, #tpu.memory_space<vmem>>, vector<1x16xf32>
    %c0_4 = arith.constant 0 : index
    %c1152 = arith.constant 1152 : index
    %4 = vector.load %arg4[%c0_4, %c1152] : memref<1x1536xf32, #tpu.memory_space<vmem>>, vector<1x16xf32>
    %c0_5 = arith.constant 0 : index
    %c1280 = arith.constant 1280 : index
    %5 = vector.load %arg4[%c0_5, %c1280] : memref<1x1536xf32, #tpu.memory_space<vmem>>, vector<1x64xf32>
    %c0_6 = arith.constant 0 : index
    %c1408 = arith.constant 1408 : index
    %6 = vector.load %arg4[%c0_6, %c1408] : memref<1x1536xf32, #tpu.memory_space<vmem>>, vector<1x64xf32>
    %c0_7 = arith.constant 0 : index
    %c0_8 = arith.constant 0 : index
    %7 = vector.load %arg0[%c0_7, %c0_8] : memref<1x512xf32, #tpu.memory_space<vmem>>, vector<1x512xf32>
    %c0_9 = arith.constant 0 : index
    %c0_10 = arith.constant 0 : index
    %8 = vector.load %arg1[%c0_9, %c0_10] : memref<512x48xf32, #tpu.memory_space<vmem>>, vector<512x48xf32>
    %cst = arith.constant dense<0.000000e+00> : vector<1x48xf32>
    %9 = tpu.matmul %7, %8, %cst {dimension_numbers = #tpu.dot_dimension_numbers<[1], [0], [0], [1], [0, 0, 1, 1], [], []>} : vector<1x512xf32>, vector<512x48xf32>, vector<1x48xf32> -> vector<1x48xf32>
    %10 = arith.addf %9, %0 : vector<1x48xf32>
    %c0_11 = arith.constant 0 : index
    %c0_12 = arith.constant 0 : index
    %11 = vector.load %arg2[%c0_11, %c0_12] : memref<48x768xf32, #tpu.memory_space<vmem>>, vector<48x768xf32>
    %cst_13 = arith.constant dense<0.000000e+00> : vector<1x768xf32>
    %12 = tpu.matmul %10, %11, %cst_13 {dimension_numbers = #tpu.dot_dimension_numbers<[1], [0], [0], [1], [0, 0, 1, 1], [], []>} : vector<1x48xf32>, vector<48x768xf32>, vector<1x768xf32> -> vector<1x768xf32>
    %13 = arith.addf %12, %1 : vector<1x768xf32>
    %c0_14 = arith.constant 0 : index
    %c0_15 = arith.constant 0 : index
    %14 = vector.load %arg6[%c0_14, %c0_15] : memref<1x768xf32, #tpu.memory_space<vmem>>, vector<1x768xf32>
    tpu.vector_store %arg6[%c0_14, %c0_15], %13 {strides = array<i32>} : memref<1x768xf32, #tpu.memory_space<vmem>>, vector<1x768xf32>,
    %c0_16 = arith.constant 0 : index
    %c0_17 = arith.constant 0 : index
    %15 = vector.load %arg6[%c0_16, %c0_17] : memref<1x768xf32, #tpu.memory_space<vmem>>, vector<1x16xf32>
    %c0_18 = arith.constant 0 : index
    %c0_19 = arith.constant 0 : index
    %16 = vector.load %arg7[%c0_18, %c0_19] : memref<48x16xf32, #tpu.memory_space<vmem>>, vector<1x16xf32>
    tpu.vector_store %arg7[%c0_18, %c0_19], %15 {strides = array<i32>} : memref<48x16xf32, #tpu.memory_space<vmem>>, vector<1x16xf32>,
    %c0_20 = arith.constant 0 : index
    %c16 = arith.constant 16 : index
    %17 = vector.load %arg6[%c0_20, %c16] : memref<1x768xf32, #tpu.memory_space<vmem>>, vector<1x16xf32>
    %c1 = arith.constant 1 : index
    %c0_21 = arith.constant 0 : index
    %18 = vector.load %arg7[%c1, %c0_21] : memref<48x16xf32, #tpu.memory_space<vmem>>, vector<1x16xf32>
    tpu.vector_store %arg7[%c1, %c0_21], %17 {strides = array<i32>} : memref<48x16xf32, #tpu.memory_space<vmem>>, vector<1x16xf32>,
    %c0_22 = arith.constant 0 : index
    %c32 = arith.constant 32 : index
    %19 = vector.load %arg6[%c0_22, %c32] : memref<1x768xf32, #tpu.memory_space<vmem>>, vector<1x16xf32>
    %c2 = arith.constant 2 : index
    %c0_23 = arith.constant 0 : index
    %20 = vector.load %arg7[%c2, %c0_23] : memref<48x16xf32, #tpu.memory_space<vmem>>, vector<1x16xf32>
    tpu.vector_store %arg7[%c2, %c0_23], %19 {strides = array<i32>} : memref<48x16xf32, #tpu.memory_space<vmem>>, vector<1x16xf32>,
    %c0_24 = arith.constant 0 : index
    %c48 = arith.constant 48 : index
    %21 = vector.load %arg6[%c0_24, %c48] : memref<1x768xf32, #tpu.memory_space<vmem>>, vector<1x16xf32>
    %c3 = arith.constant 3 : index
    %c0_25 = arith.constant 0 : index
    %22 = vector.load %arg7[%c3, %c0_25] : memref<48x16xf32, #tpu.memory_space<vmem>>, vector<1x16xf32>
    tpu.vector_store %arg7[%c3, %c0_25], %21 {strides = array<i32>} : memref<48x16xf32, #tpu.memory_space<vmem>>, vector<1x16xf32>,
    %c0_26 = arith.constant 0 : index
    %c64 = arith.constant 64 : index
    %23 = vector.load %arg6[%c0_26, %c64] : memref<1x768xf32, #tpu.memory_space<vmem>>, vector<1x16xf32>
    %c4 = arith.constant 4 : index
    %c0_27 = arith.constant 0 : index
    %24 = vector.load %arg7[%c4, %c0_27] : memref<48x16xf32, #tpu.memory_space<vmem>>, vector<1x16xf32>
    tpu.vector_store %arg7[%c4, %c0_27], %23 {strides = array<i32>} : memref<48x16xf32, #tpu.memory_space<vmem>>, vector<1x16xf32>,
    %c0_28 = arith.constant 0 : index
    %c80 = arith.constant 80 : index
    %25 = vector.load %arg6[%c0_28, %c80] : memref<1x768xf32, #tpu.memory_space<vmem>>, vector<1x16xf32>
    %c5 = arith.constant 5 : index
    %c0_29 = arith.constant 0 : index
    %26 = vector.load %arg7[%c5, %c0_29] : memref<48x16xf32, #tpu.memory_space<vmem>>, vector<1x16xf32>
    tpu.vector_store %arg7[%c5, %c0_29], %25 {strides = array<i32>} : memref<48x16xf32, #tpu.memory_space<vmem>>, vector<1x16xf32>,
    %c0_30 = arith.constant 0 : index
    %c96 = arith.constant 96 : index
    %27 = vector.load %arg6[%c0_30, %c96] : memref<1x768xf32, #tpu.memory_space<vmem>>, vector<1x16xf32>
    %c6 = arith.constant 6 : index
    %c0_31 = arith.constant 0 : index
    %28 = vector.load %arg7[%c6, %c0_31] : memref<48x16xf32, #tpu.memory_space<vmem>>, vector<1x16xf32>
    tpu.vector_store %arg7[%c6, %c0_31], %27 {strides = array<i32>} : memref<48x16xf32, #tpu.memory_space<vmem>>, vector<1x16xf32>,
    %c0_32 = arith.constant 0 : index
    %c112 = arith.constant 112 : index
    %29 = vector.load %arg6[%c0_32, %c112] : memref<1x768xf32, #tpu.memory_space<vmem>>, vector<1x16xf32>
    %c7 = arith.constant 7 : index
    %c0_33 = arith.constant 0 : index
    %30 = vector.load %arg7[%c7, %c0_33] : memref<48x16xf32, #tpu.memory_space<vmem>>, vector<1x16xf32>
    tpu.vector_store %arg7[%c7, %c0_33], %29 {strides = array<i32>} : memref<48x16xf32, #tpu.memory_space<vmem>>, vector<1x16xf32>,
    %c0_34 = arith.constant 0 : index
    %c128_35 = arith.constant 128 : index
    %31 = vector.load %arg6[%c0_34, %c128_35] : memref<1x768xf32, #tpu.memory_space<vmem>>, vector<1x16xf32>
    %c8 = arith.constant 8 : index
    %c0_36 = arith.constant 0 : index
    %32 = vector.load %arg7[%c8, %c0_36] : memref<48x16xf32, #tpu.memory_space<vmem>>, vector<1x16xf32>
    tpu.vector_store %arg7[%c8, %c0_36], %31 {strides = array<i32>} : memref<48x16xf32, #tpu.memory_space<vmem>>, vector<1x16xf32>,
    %c0_37 = arith.constant 0 : index
    %c144 = arith.constant 144 : index
    %33 = vector.load %arg6[%c0_37, %c144] : memref<1x768xf32, #tpu.memory_space<vmem>>, vector<1x16xf32>
    %c9 = arith.constant 9 : index
    %c0_38 = arith.constant 0 : index
    %34 = vector.load %arg7[%c9, %c0_38] : memref<48x16xf32, #tpu.memory_space<vmem>>, vector<1x16xf32>
    tpu.vector_store %arg7[%c9, %c0_38], %33 {strides = array<i32>} : memref<48x16xf32, #tpu.memory_space<vmem>>, vector<1x16xf32>,
    %c0_39 = arith.constant 0 : index
    %c160 = arith.constant 160 : index
    %35 = vector.load %arg6[%c0_39, %c160] : memref<1x768xf32, #tpu.memory_space<vmem>>, vector<1x16xf32>
    %c10 = arith.constant 10 : index
    %c0_40 = arith.constant 0 : index
    %36 = vector.load %arg7[%c10, %c0_40] : memref<48x16xf32, #tpu.memory_space<vmem>>, vector<1x16xf32>
    tpu.vector_store %arg7[%c10, %c0_40], %35 {strides = array<i32>} : memref<48x16xf32, #tpu.memory_space<vmem>>, vector<1x16xf32>,
    %c0_41 = arith.constant 0 : index
    %c176 = arith.constant 176 : index
    %37 = vector.load %arg6[%c0_41, %c176] : memref<1x768xf32, #tpu.memory_space<vmem>>, vector<1x16xf32>
    %c11 = arith.constant 11 : index
    %c0_42 = arith.constant 0 : index
    %38 = vector.load %arg7[%c11, %c0_42] : memref<48x16xf32, #tpu.memory_space<vmem>>, vector<1x16xf32>
    tpu.vector_store %arg7[%c11, %c0_42], %37 {strides = array<i32>} : memref<48x16xf32, #tpu.memory_space<vmem>>, vector<1x16xf32>,
    %c0_43 = arith.constant 0 : index
    %c192 = arith.constant 192 : index
    %39 = vector.load %arg6[%c0_43, %c192] : memref<1x768xf32, #tpu.memory_space<vmem>>, vector<1x16xf32>
    %c12 = arith.constant 12 : index
    %c0_44 = arith.constant 0 : index
    %40 = vector.load %arg7[%c12, %c0_44] : memref<48x16xf32, #tpu.memory_space<vmem>>, vector<1x16xf32>
    tpu.vector_store %arg7[%c12, %c0_44], %39 {strides = array<i32>} : memref<48x16xf32, #tpu.memory_space<vmem>>, vector<1x16xf32>,
    %c0_45 = arith.constant 0 : index
    %c208 = arith.constant 208 : index
    %41 = vector.load %arg6[%c0_45, %c208] : memref<1x768xf32, #tpu.memory_space<vmem>>, vector<1x16xf32>
    %c13 = arith.constant 13 : index
    %c0_46 = arith.constant 0 : index
    %42 = vector.load %arg7[%c13, %c0_46] : memref<48x16xf32, #tpu.memory_space<vmem>>, vector<1x16xf32>
    tpu.vector_store %arg7[%c13, %c0_46], %41 {strides = array<i32>} : memref<48x16xf32, #tpu.memory_space<vmem>>, vector<1x16xf32>,
    %c0_47 = arith.constant 0 : index
    %c224 = arith.constant 224 : index
    %43 = vector.load %arg6[%c0_47, %c224] : memref<1x768xf32, #tpu.memory_space<vmem>>, vector<1x16xf32>
    %c14 = arith.constant 14 : index
    %c0_48 = arith.constant 0 : index
    %44 = vector.load %arg7[%c14, %c0_48] : memref<48x16xf32, #tpu.memory_space<vmem>>, vector<1x16xf32>
    tpu.vector_store %arg7[%c14, %c0_48], %43 {strides = array<i32>} : memref<48x16xf32, #tpu.memory_space<vmem>>, vector<1x16xf32>,
    %c0_49 = arith.constant 0 : index
    %c240 = arith.constant 240 : index
    %45 = vector.load %arg6[%c0_49, %c240] : memref<1x768xf32, #tpu.memory_space<vmem>>, vector<1x16xf32>
    %c15 = arith.constant 15 : index
    %c0_50 = arith.constant 0 : index
    %46 = vector.load %arg7[%c15, %c0_50] : memref<48x16xf32, #tpu.memory_space<vmem>>, vector<1x16xf32>
    tpu.vector_store %arg7[%c15, %c0_50], %45 {strides = array<i32>} : memref<48x16xf32, #tpu.memory_space<vmem>>, vector<1x16xf32>,
    %c0_51 = arith.constant 0 : index
    %c256 = arith.constant 256 : index
    %47 = vector.load %arg6[%c0_51, %c256] : memref<1x768xf32, #tpu.memory_space<vmem>>, vector<1x16xf32>
    %c16_52 = arith.constant 16 : index
    %c0_53 = arith.constant 0 : index
    %48 = vector.load %arg7[%c16_52, %c0_53] : memref<48x16xf32, #tpu.memory_space<vmem>>, vector<1x16xf32>
    tpu.vector_store %arg7[%c16_52, %c0_53], %47 {strides = array<i32>} : memref<48x16xf32, #tpu.memory_space<vmem>>, vector<1x16xf32>,
    %c0_54 = arith.constant 0 : index
    %c272 = arith.constant 272 : index
    %49 = vector.load %arg6[%c0_54, %c272] : memref<1x768xf32, #tpu.memory_space<vmem>>, vector<1x16xf32>
    %c17 = arith.constant 17 : index
    %c0_55 = arith.constant 0 : index
    %50 = vector.load %arg7[%c17, %c0_55] : memref<48x16xf32, #tpu.memory_space<vmem>>, vector<1x16xf32>
    tpu.vector_store %arg7[%c17, %c0_55], %49 {strides = array<i32>} : memref<48x16xf32, #tpu.memory_space<vmem>>, vector<1x16xf32>,
    %c0_56 = arith.constant 0 : index
    %c288 = arith.constant 288 : index
    %51 = vector.load %arg6[%c0_56, %c288] : memref<1x768xf32, #tpu.memory_space<vmem>>, vector<1x16xf32>
    %c18 = arith.constant 18 : index
    %c0_57 = arith.constant 0 : index
    %52 = vector.load %arg7[%c18, %c0_57] : memref<48x16xf32, #tpu.memory_space<vmem>>, vector<1x16xf32>
    tpu.vector_store %arg7[%c18, %c0_57], %51 {strides = array<i32>} : memref<48x16xf32, #tpu.memory_space<vmem>>, vector<1x16xf32>,
    %c0_58 = arith.constant 0 : index
    %c304 = arith.constant 304 : index
    %53 = vector.load %arg6[%c0_58, %c304] : memref<1x768xf32, #tpu.memory_space<vmem>>, vector<1x16xf32>
    %c19 = arith.constant 19 : index
    %c0_59 = arith.constant 0 : index
    %54 = vector.load %arg7[%c19, %c0_59] : memref<48x16xf32, #tpu.memory_space<vmem>>, vector<1x16xf32>
    tpu.vector_store %arg7[%c19, %c0_59], %53 {strides = array<i32>} : memref<48x16xf32, #tpu.memory_space<vmem>>, vector<1x16xf32>,
    %c0_60 = arith.constant 0 : index
    %c320 = arith.constant 320 : index
    %55 = vector.load %arg6[%c0_60, %c320] : memref<1x768xf32, #tpu.memory_space<vmem>>, vector<1x16xf32>
    %c20 = arith.constant 20 : index
    %c0_61 = arith.constant 0 : index
    %56 = vector.load %arg7[%c20, %c0_61] : memref<48x16xf32, #tpu.memory_space<vmem>>, vector<1x16xf32>
    tpu.vector_store %arg7[%c20, %c0_61], %55 {strides = array<i32>} : memref<48x16xf32, #tpu.memory_space<vmem>>, vector<1x16xf32>,
    %c0_62 = arith.constant 0 : index
    %c336 = arith.constant 336 : index
    %57 = vector.load %arg6[%c0_62, %c336] : memref<1x768xf32, #tpu.memory_space<vmem>>, vector<1x16xf32>
    %c21 = arith.constant 21 : index
    %c0_63 = arith.constant 0 : index
    %58 = vector.load %arg7[%c21, %c0_63] : memref<48x16xf32, #tpu.memory_space<vmem>>, vector<1x16xf32>
    tpu.vector_store %arg7[%c21, %c0_63], %57 {strides = array<i32>} : memref<48x16xf32, #tpu.memory_space<vmem>>, vector<1x16xf32>,
    %c0_64 = arith.constant 0 : index
    %c352 = arith.constant 352 : index
    %59 = vector.load %arg6[%c0_64, %c352] : memref<1x768xf32, #tpu.memory_space<vmem>>, vector<1x16xf32>
    %c22 = arith.constant 22 : index
    %c0_65 = arith.constant 0 : index
    %60 = vector.load %arg7[%c22, %c0_65] : memref<48x16xf32, #tpu.memory_space<vmem>>, vector<1x16xf32>
    tpu.vector_store %arg7[%c22, %c0_65], %59 {strides = array<i32>} : memref<48x16xf32, #tpu.memory_space<vmem>>, vector<1x16xf32>,
    %c0_66 = arith.constant 0 : index
    %c368 = arith.constant 368 : index
    %61 = vector.load %arg6[%c0_66, %c368] : memref<1x768xf32, #tpu.memory_space<vmem>>, vector<1x16xf32>
    %c23 = arith.constant 23 : index
    %c0_67 = arith.constant 0 : index
    %62 = vector.load %arg7[%c23, %c0_67] : memref<48x16xf32, #tpu.memory_space<vmem>>, vector<1x16xf32>
    tpu.vector_store %arg7[%c23, %c0_67], %61 {strides = array<i32>} : memref<48x16xf32, #tpu.memory_space<vmem>>, vector<1x16xf32>,
    %c0_68 = arith.constant 0 : index
    %c384 = arith.constant 384 : index
    %63 = vector.load %arg6[%c0_68, %c384] : memref<1x768xf32, #tpu.memory_space<vmem>>, vector<1x16xf32>
    %c24 = arith.constant 24 : index
    %c0_69 = arith.constant 0 : index
    %64 = vector.load %arg7[%c24, %c0_69] : memref<48x16xf32, #tpu.memory_space<vmem>>, vector<1x16xf32>
    tpu.vector_store %arg7[%c24, %c0_69], %63 {strides = array<i32>} : memref<48x16xf32, #tpu.memory_space<vmem>>, vector<1x16xf32>,
    %c0_70 = arith.constant 0 : index
    %c400 = arith.constant 400 : index
    %65 = vector.load %arg6[%c0_70, %c400] : memref<1x768xf32, #tpu.memory_space<vmem>>, vector<1x16xf32>
    %c25 = arith.constant 25 : index
    %c0_71 = arith.constant 0 : index
    %66 = vector.load %arg7[%c25, %c0_71] : memref<48x16xf32, #tpu.memory_space<vmem>>, vector<1x16xf32>
    tpu.vector_store %arg7[%c25, %c0_71], %65 {strides = array<i32>} : memref<48x16xf32, #tpu.memory_space<vmem>>, vector<1x16xf32>,
    %c0_72 = arith.constant 0 : index
    %c416 = arith.constant 416 : index
    %67 = vector.load %arg6[%c0_72, %c416] : memref<1x768xf32, #tpu.memory_space<vmem>>, vector<1x16xf32>
    %c26 = arith.constant 26 : index
    %c0_73 = arith.constant 0 : index
    %68 = vector.load %arg7[%c26, %c0_73] : memref<48x16xf32, #tpu.memory_space<vmem>>, vector<1x16xf32>
    tpu.vector_store %arg7[%c26, %c0_73], %67 {strides = array<i32>} : memref<48x16xf32, #tpu.memory_space<vmem>>, vector<1x16xf32>,
    %c0_74 = arith.constant 0 : index
    %c432 = arith.constant 432 : index
    %69 = vector.load %arg6[%c0_74, %c432] : memref<1x768xf32, #tpu.memory_space<vmem>>, vector<1x16xf32>
    %c27 = arith.constant 27 : index
    %c0_75 = arith.constant 0 : index
    %70 = vector.load %arg7[%c27, %c0_75] : memref<48x16xf32, #tpu.memory_space<vmem>>, vector<1x16xf32>
    tpu.vector_store %arg7[%c27, %c0_75], %69 {strides = array<i32>} : memref<48x16xf32, #tpu.memory_space<vmem>>, vector<1x16xf32>,
    %c0_76 = arith.constant 0 : index
    %c448 = arith.constant 448 : index
    %71 = vector.load %arg6[%c0_76, %c448] : memref<1x768xf32, #tpu.memory_space<vmem>>, vector<1x16xf32>
    %c28 = arith.constant 28 : index
    %c0_77 = arith.constant 0 : index
    %72 = vector.load %arg7[%c28, %c0_77] : memref<48x16xf32, #tpu.memory_space<vmem>>, vector<1x16xf32>
    tpu.vector_store %arg7[%c28, %c0_77], %71 {strides = array<i32>} : memref<48x16xf32, #tpu.memory_space<vmem>>, vector<1x16xf32>,
    %c0_78 = arith.constant 0 : index
    %c464 = arith.constant 464 : index
    %73 = vector.load %arg6[%c0_78, %c464] : memref<1x768xf32, #tpu.memory_space<vmem>>, vector<1x16xf32>
    %c29 = arith.constant 29 : index
    %c0_79 = arith.constant 0 : index
    %74 = vector.load %arg7[%c29, %c0_79] : memref<48x16xf32, #tpu.memory_space<vmem>>, vector<1x16xf32>
    tpu.vector_store %arg7[%c29, %c0_79], %73 {strides = array<i32>} : memref<48x16xf32, #tpu.memory_space<vmem>>, vector<1x16xf32>,
    %c0_80 = arith.constant 0 : index
    %c480 = arith.constant 480 : index
    %75 = vector.load %arg6[%c0_80, %c480] : memref<1x768xf32, #tpu.memory_space<vmem>>, vector<1x16xf32>
    %c30 = arith.constant 30 : index
    %c0_81 = arith.constant 0 : index
    %76 = vector.load %arg7[%c30, %c0_81] : memref<48x16xf32, #tpu.memory_space<vmem>>, vector<1x16xf32>
    tpu.vector_store %arg7[%c30, %c0_81], %75 {strides = array<i32>} : memref<48x16xf32, #tpu.memory_space<vmem>>, vector<1x16xf32>,
    %c0_82 = arith.constant 0 : index
    %c496 = arith.constant 496 : index
    %77 = vector.load %arg6[%c0_82, %c496] : memref<1x768xf32, #tpu.memory_space<vmem>>, vector<1x16xf32>
    %c31 = arith.constant 31 : index
    %c0_83 = arith.constant 0 : index
    %78 = vector.load %arg7[%c31, %c0_83] : memref<48x16xf32, #tpu.memory_space<vmem>>, vector<1x16xf32>
    tpu.vector_store %arg7[%c31, %c0_83], %77 {strides = array<i32>} : memref<48x16xf32, #tpu.memory_space<vmem>>, vector<1x16xf32>,
    %c0_84 = arith.constant 0 : index
    %c512 = arith.constant 512 : index
    %79 = vector.load %arg6[%c0_84, %c512] : memref<1x768xf32, #tpu.memory_space<vmem>>, vector<1x16xf32>
    %c32_85 = arith.constant 32 : index
    %c0_86 = arith.constant 0 : index
    %80 = vector.load %arg7[%c32_85, %c0_86] : memref<48x16xf32, #tpu.memory_space<vmem>>, vector<1x16xf32>
    tpu.vector_store %arg7[%c32_85, %c0_86], %79 {strides = array<i32>} : memref<48x16xf32, #tpu.memory_space<vmem>>, vector<1x16xf32>,
    %c0_87 = arith.constant 0 : index
    %c528 = arith.constant 528 : index
    %81 = vector.load %arg6[%c0_87, %c528] : memref<1x768xf32, #tpu.memory_space<vmem>>, vector<1x16xf32>
    %c33 = arith.constant 33 : index
    %c0_88 = arith.constant 0 : index
    %82 = vector.load %arg7[%c33, %c0_88] : memref<48x16xf32, #tpu.memory_space<vmem>>, vector<1x16xf32>
    tpu.vector_store %arg7[%c33, %c0_88], %81 {strides = array<i32>} : memref<48x16xf32, #tpu.memory_space<vmem>>, vector<1x16xf32>,
    %c0_89 = arith.constant 0 : index
    %c544 = arith.constant 544 : index
    %83 = vector.load %arg6[%c0_89, %c544] : memref<1x768xf32, #tpu.memory_space<vmem>>, vector<1x16xf32>
    %c34 = arith.constant 34 : index
    %c0_90 = arith.constant 0 : index
    %84 = vector.load %arg7[%c34, %c0_90] : memref<48x16xf32, #tpu.memory_space<vmem>>, vector<1x16xf32>
    tpu.vector_store %arg7[%c34, %c0_90], %83 {strides = array<i32>} : memref<48x16xf32, #tpu.memory_space<vmem>>, vector<1x16xf32>,
    %c0_91 = arith.constant 0 : index
    %c560 = arith.constant 560 : index
    %85 = vector.load %arg6[%c0_91, %c560] : memref<1x768xf32, #tpu.memory_space<vmem>>, vector<1x16xf32>
    %c35 = arith.constant 35 : index
    %c0_92 = arith.constant 0 : index
    %86 = vector.load %arg7[%c35, %c0_92] : memref<48x16xf32, #tpu.memory_space<vmem>>, vector<1x16xf32>
    tpu.vector_store %arg7[%c35, %c0_92], %85 {strides = array<i32>} : memref<48x16xf32, #tpu.memory_space<vmem>>, vector<1x16xf32>,
    %c0_93 = arith.constant 0 : index
    %c576 = arith.constant 576 : index
    %87 = vector.load %arg6[%c0_93, %c576] : memref<1x768xf32, #tpu.memory_space<vmem>>, vector<1x16xf32>
    %c36 = arith.constant 36 : index
    %c0_94 = arith.constant 0 : index
    %88 = vector.load %arg7[%c36, %c0_94] : memref<48x16xf32, #tpu.memory_space<vmem>>, vector<1x16xf32>
    tpu.vector_store %arg7[%c36, %c0_94], %87 {strides = array<i32>} : memref<48x16xf32, #tpu.memory_space<vmem>>, vector<1x16xf32>,
    %c0_95 = arith.constant 0 : index
    %c592 = arith.constant 592 : index
    %89 = vector.load %arg6[%c0_95, %c592] : memref<1x768xf32, #tpu.memory_space<vmem>>, vector<1x16xf32>
    %c37 = arith.constant 37 : index
    %c0_96 = arith.constant 0 : index
    %90 = vector.load %arg7[%c37, %c0_96] : memref<48x16xf32, #tpu.memory_space<vmem>>, vector<1x16xf32>
    tpu.vector_store %arg7[%c37, %c0_96], %89 {strides = array<i32>} : memref<48x16xf32, #tpu.memory_space<vmem>>, vector<1x16xf32>,
    %c0_97 = arith.constant 0 : index
    %c608 = arith.constant 608 : index
    %91 = vector.load %arg6[%c0_97, %c608] : memref<1x768xf32, #tpu.memory_space<vmem>>, vector<1x16xf32>
    %c38 = arith.constant 38 : index
    %c0_98 = arith.constant 0 : index
    %92 = vector.load %arg7[%c38, %c0_98] : memref<48x16xf32, #tpu.memory_space<vmem>>, vector<1x16xf32>
    tpu.vector_store %arg7[%c38, %c0_98], %91 {strides = array<i32>} : memref<48x16xf32, #tpu.memory_space<vmem>>, vector<1x16xf32>,
    %c0_99 = arith.constant 0 : index
    %c624 = arith.constant 624 : index
    %93 = vector.load %arg6[%c0_99, %c624] : memref<1x768xf32, #tpu.memory_space<vmem>>, vector<1x16xf32>
    %c39 = arith.constant 39 : index
    %c0_100 = arith.constant 0 : index
    %94 = vector.load %arg7[%c39, %c0_100] : memref<48x16xf32, #tpu.memory_space<vmem>>, vector<1x16xf32>
    tpu.vector_store %arg7[%c39, %c0_100], %93 {strides = array<i32>} : memref<48x16xf32, #tpu.memory_space<vmem>>, vector<1x16xf32>,
    %c0_101 = arith.constant 0 : index
    %c640 = arith.constant 640 : index
    %95 = vector.load %arg6[%c0_101, %c640] : memref<1x768xf32, #tpu.memory_space<vmem>>, vector<1x16xf32>
    %c40 = arith.constant 40 : index
    %c0_102 = arith.constant 0 : index
    %96 = vector.load %arg7[%c40, %c0_102] : memref<48x16xf32, #tpu.memory_space<vmem>>, vector<1x16xf32>
    tpu.vector_store %arg7[%c40, %c0_102], %95 {strides = array<i32>} : memref<48x16xf32, #tpu.memory_space<vmem>>, vector<1x16xf32>,
    %c0_103 = arith.constant 0 : index
    %c656 = arith.constant 656 : index
    %97 = vector.load %arg6[%c0_103, %c656] : memref<1x768xf32, #tpu.memory_space<vmem>>, vector<1x16xf32>
    %c41 = arith.constant 41 : index
    %c0_104 = arith.constant 0 : index
    %98 = vector.load %arg7[%c41, %c0_104] : memref<48x16xf32, #tpu.memory_space<vmem>>, vector<1x16xf32>
    tpu.vector_store %arg7[%c41, %c0_104], %97 {strides = array<i32>} : memref<48x16xf32, #tpu.memory_space<vmem>>, vector<1x16xf32>,
    %c0_105 = arith.constant 0 : index
    %c672 = arith.constant 672 : index
    %99 = vector.load %arg6[%c0_105, %c672] : memref<1x768xf32, #tpu.memory_space<vmem>>, vector<1x16xf32>
    %c42 = arith.constant 42 : index
    %c0_106 = arith.constant 0 : index
    %100 = vector.load %arg7[%c42, %c0_106] : memref<48x16xf32, #tpu.memory_space<vmem>>, vector<1x16xf32>
    tpu.vector_store %arg7[%c42, %c0_106], %99 {strides = array<i32>} : memref<48x16xf32, #tpu.memory_space<vmem>>, vector<1x16xf32>,
    %c0_107 = arith.constant 0 : index
    %c688 = arith.constant 688 : index
    %101 = vector.load %arg6[%c0_107, %c688] : memref<1x768xf32, #tpu.memory_space<vmem>>, vector<1x16xf32>
    %c43 = arith.constant 43 : index
    %c0_108 = arith.constant 0 : index
    %102 = vector.load %arg7[%c43, %c0_108] : memref<48x16xf32, #tpu.memory_space<vmem>>, vector<1x16xf32>
    tpu.vector_store %arg7[%c43, %c0_108], %101 {strides = array<i32>} : memref<48x16xf32, #tpu.memory_space<vmem>>, vector<1x16xf32>,
    %c0_109 = arith.constant 0 : index
    %c704 = arith.constant 704 : index
    %103 = vector.load %arg6[%c0_109, %c704] : memref<1x768xf32, #tpu.memory_space<vmem>>, vector<1x16xf32>
    %c44 = arith.constant 44 : index
    %c0_110 = arith.constant 0 : index
    %104 = vector.load %arg7[%c44, %c0_110] : memref<48x16xf32, #tpu.memory_space<vmem>>, vector<1x16xf32>
    tpu.vector_store %arg7[%c44, %c0_110], %103 {strides = array<i32>} : memref<48x16xf32, #tpu.memory_space<vmem>>, vector<1x16xf32>,
    %c0_111 = arith.constant 0 : index
    %c720 = arith.constant 720 : index
    %105 = vector.load %arg6[%c0_111, %c720] : memref<1x768xf32, #tpu.memory_space<vmem>>, vector<1x16xf32>
    %c45 = arith.constant 45 : index
    %c0_112 = arith.constant 0 : index
    %106 = vector.load %arg7[%c45, %c0_112] : memref<48x16xf32, #tpu.memory_space<vmem>>, vector<1x16xf32>
    tpu.vector_store %arg7[%c45, %c0_112], %105 {strides = array<i32>} : memref<48x16xf32, #tpu.memory_space<vmem>>, vector<1x16xf32>,
    %c0_113 = arith.constant 0 : index
    %c736 = arith.constant 736 : index
    %107 = vector.load %arg6[%c0_113, %c736] : memref<1x768xf32, #tpu.memory_space<vmem>>, vector<1x16xf32>
    %c46 = arith.constant 46 : index
    %c0_114 = arith.constant 0 : index
    %108 = vector.load %arg7[%c46, %c0_114] : memref<48x16xf32, #tpu.memory_space<vmem>>, vector<1x16xf32>
    tpu.vector_store %arg7[%c46, %c0_114], %107 {strides = array<i32>} : memref<48x16xf32, #tpu.memory_space<vmem>>, vector<1x16xf32>,
    %c0_115 = arith.constant 0 : index
    %c752 = arith.constant 752 : index
    %109 = vector.load %arg6[%c0_115, %c752] : memref<1x768xf32, #tpu.memory_space<vmem>>, vector<1x16xf32>
    %c47 = arith.constant 47 : index
    %c0_116 = arith.constant 0 : index
    %110 = vector.load %arg7[%c47, %c0_116] : memref<48x16xf32, #tpu.memory_space<vmem>>, vector<1x16xf32>
    tpu.vector_store %arg7[%c47, %c0_116], %109 {strides = array<i32>} : memref<48x16xf32, #tpu.memory_space<vmem>>, vector<1x16xf32>,
    %c0_117 = arith.constant 0 : index
    %c0_118 = arith.constant 0 : index
    %111 = vector.load %arg7[%c0_117, %c0_118] : memref<48x16xf32, #tpu.memory_space<vmem>>, vector<48x16xf32>
    %cst_119 = arith.constant dense<0.000000e+00> : vector<48xf32>
    %112 = vector.multi_reduction <add>, %111, %cst_119 [1] : vector<48x16xf32> to vector<48xf32>
    %113 = vector.shape_cast %112 : vector<48xf32> to vector<48x1xf32>
    %cst_120 = arith.constant 1.600000e+01 : f32
    %114 = vector.broadcast %cst_120 : f32 to vector<48x1xf32>
    %115 = arith.divf %113, %114 : vector<48x1xf32>
    %116 = vector.broadcast %115 : vector<48x1xf32> to vector<48x16xf32>
    %117 = arith.subf %111, %116 : vector<48x16xf32>
    %118 = arith.mulf %117, %117 : vector<48x16xf32>
    %cst_121 = arith.constant dense<0.000000e+00> : vector<48xf32>
    %119 = vector.multi_reduction <add>, %118, %cst_121 [1] : vector<48x16xf32> to vector<48xf32>
    %120 = vector.shape_cast %119 : vector<48xf32> to vector<48x1xf32>
    %cst_122 = arith.constant 1.600000e+01 : f32
    %121 = vector.broadcast %cst_122 : f32 to vector<48x1xf32>
    %122 = arith.divf %120, %121 : vector<48x1xf32>
    %123 = vector.broadcast %115 : vector<48x1xf32> to vector<48x16xf32>
    %124 = arith.subf %111, %123 : vector<48x16xf32>
    %cst_123 = arith.constant 9.99999974E-6 : f32
    %125 = vector.broadcast %cst_123 : f32 to vector<48x1xf32>
    %126 = arith.addf %122, %125 : vector<48x1xf32>
    %127 = math.rsqrt %126 : vector<48x1xf32>
    %128 = vector.broadcast %127 : vector<48x1xf32> to vector<48x16xf32>
    %129 = arith.mulf %124, %128 : vector<48x16xf32>
    %130 = vector.broadcast %3 : vector<1x16xf32> to vector<48x16xf32>
    %131 = arith.mulf %129, %130 : vector<48x16xf32>
    %132 = vector.broadcast %4 : vector<1x16xf32> to vector<48x16xf32>
    %133 = arith.addf %131, %132 : vector<48x16xf32>
    %c0_124 = arith.constant 0 : index
    %c0_125 = arith.constant 0 : index
    %134 = vector.load %arg3[%c0_124, %c0_125] : memref<16x64xf32, #tpu.memory_space<vmem>>, vector<16x64xf32>
    %cst_126 = arith.constant dense<0.000000e+00> : vector<48x64xf32>
    %135 = tpu.matmul %133, %134, %cst_126 {dimension_numbers = #tpu.dot_dimension_numbers<[1], [0], [0], [1], [0, 0, 1, 1], [], []>} : vector<48x16xf32>, vector<16x64xf32>, vector<48x64xf32> -> vector<48x64xf32>
    %136 = vector.broadcast %2 : vector<1x64xf32> to vector<48x64xf32>
    %137 = arith.addf %135, %136 : vector<48x64xf32>
    %cst_127 = arith.constant dense<0.000000e+00> : vector<48xf32>
    %138 = vector.multi_reduction <add>, %137, %cst_127 [1] : vector<48x64xf32> to vector<48xf32>
    %139 = vector.shape_cast %138 : vector<48xf32> to vector<48x1xf32>
    %cst_128 = arith.constant 6.400000e+01 : f32
    %140 = vector.broadcast %cst_128 : f32 to vector<48x1xf32>
    %141 = arith.divf %139, %140 : vector<48x1xf32>
    %142 = vector.broadcast %141 : vector<48x1xf32> to vector<48x64xf32>
    %143 = arith.subf %137, %142 : vector<48x64xf32>
    %144 = arith.mulf %143, %143 : vector<48x64xf32>
    %cst_129 = arith.constant dense<0.000000e+00> : vector<48xf32>
    %145 = vector.multi_reduction <add>, %144, %cst_129 [1] : vector<48x64xf32> to vector<48xf32>
    %146 = vector.shape_cast %145 : vector<48xf32> to vector<48x1xf32>
    %cst_130 = arith.constant 6.400000e+01 : f32
    %147 = vector.broadcast %cst_130 : f32 to vector<48x1xf32>
    %148 = arith.divf %146, %147 : vector<48x1xf32>
    %149 = vector.broadcast %141 : vector<48x1xf32> to vector<48x64xf32>
    %150 = arith.subf %137, %149 : vector<48x64xf32>
    %cst_131 = arith.constant 9.99999974E-6 : f32
    %151 = vector.broadcast %cst_131 : f32 to vector<48x1xf32>
    %152 = arith.addf %148, %151 : vector<48x1xf32>
    %153 = math.rsqrt %152 : vector<48x1xf32>
    %154 = vector.broadcast %153 : vector<48x1xf32> to vector<48x64xf32>
    %155 = arith.mulf %150, %154 : vector<48x64xf32>
    %156 = vector.broadcast %5 : vector<1x64xf32> to vector<48x64xf32>
    %157 = arith.mulf %155, %156 : vector<48x64xf32>
    %158 = vector.broadcast %6 : vector<1x64xf32> to vector<48x64xf32>
    %159 = arith.addf %157, %158 : vector<48x64xf32>
    %c0_132 = arith.constant 0 : index
    %c0_133 = arith.constant 0 : index
    %160 = vector.load %arg5[%c0_132, %c0_133] : memref<48x64xf32, #tpu.memory_space<vmem>>, vector<48x64xf32>
    tpu.vector_store %arg5[%c0_132, %c0_133], %159 {strides = array<i32>} : memref<48x64xf32, #tpu.memory_space<vmem>>, vector<48x64xf32>,
    return
  }
}

</mosaic_0001>

<bundles_post_ra>
// kernel: hypernetwork_layernorm.1
= control target key start
LH: loop header
LB: loop body
LE: loop exit
PB: predicated region body
PF: predicated region fallthrough
CT: control target
= control target key end

     0   :  { %v94_v47 = vlaneseq  ;;  %s2239_s0 = inlined_call_operand.vmem [shape: f32[1,512], index: 0, kind: input, shape index: {}]   ;;  %s2240_s1 = inlined_call_operand.vmem [shape: f32[512,48], index: 1, kind: input, shape index: {}]   ;;  %s2241_s2 = inlined_call_operand.vmem [shape: f32[48,768], index: 2, kind: input, shape index: {}]   ;;  %s2242_s3 = inlined_call_operand.vmem [shape: f32[16,64], index: 3, kind: input, shape index: {}]   ;;  %s2243_s4 = inlined_call_operand.vmem [shape: f32[1,1536], index: 4, kind: input, shape index: {}]   ;;  %s2244_s5 = inlined_call_operand.hbm [shape: f32[48,64], index: 5, kind: output, shape index: {}]  }
   0x1   :  { %v45_v0 = vld [vmem:[%s2240_s1 + $0x80] sm:$0xff]  ;;  %v46_v1 = vld [vmem:[%s2240_s1 + $0x88] sm:$0xff]  ;;  %v47_v11 = vld [vmem:[%s2240_s1 + $0x90] sm:$0xff] }
   0x2   :  { %v29_v2 = vld [vmem:[%s2240_s1] sm:$0xff]  ;;  %v1527_v3 = vpack.c.bf16 %v46_v1, %v45_v0  ;;  %v30_v4 = vld [vmem:[%s2240_s1 + $0x8] sm:$0xff]  ;;  %v48_v13 = vld [vmem:[%s2240_s1 + $0x98] sm:$0xff]  ;;  %v1860_v61 = vshrl.u32 %v94_v47, 7 }
   0x3   :  { %v77_v5 = vld [vmem:[%s2240_s1 + $0x180] sm:$0xff]  ;;  %v78_v6 = vld [vmem:[%s2240_s1 + $0x188] sm:$0xff]  ;;  %v1529_v7 = vpack.c.bf16 %v30_v4, %v29_v2  ;;  %v31_v14 = vld [vmem:[%s2240_s1 + $0x10] sm:$0xff]  ;;  %v1531_v16 = vpack.c.bf16 %v48_v13, %v47_v11 }
   0x4   :  { %v1559_v8 = vpack.c.bf16 %v78_v6, %v77_v5  ;;  %v61_v9 = vld [vmem:[%s2240_s1 + $0x100] sm:$0xff]  ;;  %v62_v10 = vld [vmem:[%s2240_s1 + $0x108] sm:$0xff]  ;;  %1528 = vmatprep.subr.bf16.mxu0 %v1527_v3  ;;  %v32_v15 = vld [vmem:[%s2240_s1 + $0x18] sm:$0xff]  ;;  %v108_v11 = vsub.s32 3, %v1860_v61 }
   0x5   :  { %v1561_v12 = vpack.c.bf16 %v62_v10, %v61_v9  ;;  %1530 = vmatpush3.bf16.msra.mxu0 %v1529_v7  ;;  %v1533_v17 = vpack.c.bf16 %v32_v15, %v31_v14  ;;  %v79_v18 = vld [vmem:[%s2240_s1 + $0x190] sm:$0xff]  ;;  %v80_v19 = vld [vmem:[%s2240_s1 + $0x198] sm:$0xff]  ;;  %v49_v23 = vld [vmem:[%s2240_s1 + $0xa0] sm:$0xff]  ;;  %v100_v10 = vsub.s32 1, %v1860_v61 }
   0x6   :  { %1560 = vmatprep.subr.bf16.mxu1 %v1559_v8  ;;  %v63_v20 = vld [vmem:[%s2240_s1 + $0x110] sm:$0xff]  ;;  %v1563_v21 = vpack.c.bf16 %v80_v19, %v79_v18  ;;  %v64_v22 = vld [vmem:[%s2240_s1 + $0x118] sm:$0xff]  ;;  %v50_v24 = vld [vmem:[%s2240_s1 + $0xa8] sm:$0xff]  ;;  %1532 = vmatprep.subr.bf16.mxu0 %v1531_v16 }
   0x7   :  { %1562 = vmatpush3.bf16.msra.mxu1 %v1561_v12  ;;  %v1565_v25 = vpack.c.bf16 %v64_v22, %v63_v20  ;;  %v1535_v26 = vpack.c.bf16 %v50_v24, %v49_v23  ;;  %v33_v27 = vld [vmem:[%s2240_s1 + $0x20] sm:$0xff]  ;;  %v34_v28 = vld [vmem:[%s2240_s1 + $0x28] sm:$0xff]  ;;  %v51_v35 = vld [vmem:[%s2240_s1 + $0xb0] sm:$0xff] }
   0x8   :  { %v81_v29 = vld [vmem:[%s2240_s1 + $0x1a0] sm:$0xff]  ;;  %1564 = vmatprep.subr.bf16.mxu1 %v1563_v21  ;;  %v82_v30 = vld [vmem:[%s2240_s1 + $0x1a8] sm:$0xff]  ;;  %v1537_v33 = vpack.c.bf16 %v34_v28, %v33_v27  ;;  %v52_v36 = vld [vmem:[%s2240_s1 + $0xb8] sm:$0xff] }
   0x9   :  { %v65_v31 = vld [vmem:[%s2240_s1 + $0x120] sm:$0xff]  ;;  %v66_v32 = vld [vmem:[%s2240_s1 + $0x128] sm:$0xff]  ;;  %1534 = vmatpush3.bf16.msra.mxu0 %v1533_v17  ;;  %v1567_v34 = vpack.c.bf16 %v82_v30, %v81_v29  ;;  %v35_v37 = vld [vmem:[%s2240_s1 + $0x30] sm:$0xff]  ;;  %v1539_v39 = vpack.c.bf16 %v52_v36, %v51_v35 }
   0xa   :  { %1536 = vmatprep.subr.bf16.mxu0 %v1535_v26  ;;  %v1569_v38 = vpack.c.bf16 %v66_v32, %v65_v31  ;;  %v36_v40 = vld [vmem:[%s2240_s1 + $0x38] sm:$0xff]  ;;  %v83_v41 = vld [vmem:[%s2240_s1 + $0x1b0] sm:$0xff]  ;;  %v53_v46 = vld [vmem:[%s2240_s1 + $0xc0] sm:$0xff] }
   0xb   :  { %1566 = vmatpush3.bf16.msra.mxu1 %v1565_v25  ;;  %v84_v42 = vld [vmem:[%s2240_s1 + $0x1b8] sm:$0xff]  ;;  %v67_v44 = vld [vmem:[%s2240_s1 + $0x130] sm:$0xff]  ;;  %v54_v48 = vld [vmem:[%s2240_s1 + $0xc8] sm:$0xff]  ;;  %v1541_v49 = vpack.c.bf16 %v36_v40, %v35_v37 }
   0xc   :  { %1568 = vmatprep.subr.bf16.mxu1 %v1567_v34  ;;  %v1571_v43 = vpack.c.bf16 %v84_v42, %v83_v41  ;;  %v68_v45 = vld [vmem:[%s2240_s1 + $0x138] sm:$0xff]  ;;  %v85_v50 = vld [vmem:[%s2240_s1 + $0x1c0] sm:$0xff]  ;;  %v86_v51 = vld [vmem:[%s2240_s1 + $0x1c8] sm:$0xff]  ;;  %v1543_v53 = vpack.c.bf16 %v54_v48, %v53_v46 }
   0xd   :  { %1538 = vmatpush3.bf16.msra.mxu0 %v1537_v33  ;;  %v1573_v52 = vpack.c.bf16 %v68_v45, %v67_v44  ;;  %v37_v54 = vld [vmem:[%s2240_s1 + $0x40] sm:$0xff]  ;;  %v38_v55 = vld [vmem:[%s2240_s1 + $0x48] sm:$0xff]  ;;  %v1575_v57 = vpack.c.bf16 %v86_v51, %v85_v50  ;;  %v55_v59 = vld [vmem:[%s2240_s1 + $0xd0] sm:$0xff] }
   0xe   :  { %1540 = vmatprep.subr.bf16.mxu0 %v1539_v39  ;;  %v69_v56 = vld [vmem:[%s2240_s1 + $0x140] sm:$0xff]  ;;  %v70_v58 = vld [vmem:[%s2240_s1 + $0x148] sm:$0xff]  ;;  %v56_v60 = vld [vmem:[%s2240_s1 + $0xd8] sm:$0xff]  ;;  %v1545_v0 = vpack.c.bf16 %v38_v55, %v37_v54 }
   0xf   :  { %1570 = vmatpush3.bf16.msra.mxu1 %v1569_v38  ;;  %v87_v62 = vld [vmem:[%s2240_s1 + $0x1d0] sm:$0xff]  ;;  %v88_v63 = vld [vmem:[%s2240_s1 + $0x1d8] sm:$0xff]  ;;  %v1577_v1 = vpack.c.bf16 %v70_v58, %v69_v56  ;;  %v1547_v2 = vpack.c.bf16 %v56_v60, %v55_v59  ;;  %v57_v8 = vld [vmem:[%s2240_s1 + $0xe0] sm:$0xff] }
  0x10   :  { %1572 = vmatprep.subr.bf16.mxu1 %v1571_v43  ;;  %v39_v3 = vld [vmem:[%s2240_s1 + $0x50] sm:$0xff]  ;;  %v40_v4 = vld [vmem:[%s2240_s1 + $0x58] sm:$0xff]  ;;  %v1579_v6 = vpack.c.bf16 %v88_v63, %v87_v62  ;;  %v58_v9 = vld [vmem:[%s2240_s1 + $0xe8] sm:$0xff] }
  0x11   :  { %1542 = vmatpush3.bf16.msra.mxu0 %v1541_v49  ;;  %v71_v5 = vld [vmem:[%s2240_s1 + $0x150] sm:$0xff]  ;;  %v72_v7 = vld [vmem:[%s2240_s1 + $0x158] sm:$0xff]  ;;  %v89_v12 = vld [vmem:[%s2240_s1 + $0x1e0] sm:$0xff]  ;;  %v1549_v14 = vpack.c.bf16 %v40_v4, %v39_v3  ;;  %v1551_v17 = vpack.c.bf16 %v58_v9, %v57_v8 }
  0x12   :  { %1544 = vmatprep.subr.bf16.mxu0 %v1543_v53  ;;  %v90_v13 = vld [vmem:[%s2240_s1 + $0x1e8] sm:$0xff]  ;;  %v41_v15 = vld [vmem:[%s2240_s1 + $0x60] sm:$0xff]  ;;  %v1581_v16 = vpack.c.bf16 %v72_v7, %v71_v5  ;;  %v59_v23 = vld [vmem:[%s2240_s1 + $0xf0] sm:$0xff] }
  0x13   :  { %1574 = vmatpush3.bf16.msra.mxu1 %v1573_v52  ;;  %v42_v18 = vld [vmem:[%s2240_s1 + $0x68] sm:$0xff]  ;;  %v73_v19 = vld [vmem:[%s2240_s1 + $0x160] sm:$0xff]  ;;  %v1583_v21 = vpack.c.bf16 %v90_v13, %v89_v12  ;;  %v60_v24 = vld [vmem:[%s2240_s1 + $0xf8] sm:$0xff] }
  0x14   :  { %1576 = vmatprep.subr.bf16.mxu1 %v1575_v57  ;;  %v28_v20 = vld [vmem:[%s2239_s0] sm:$0xf]  ;;  %v74_v22 = vld [vmem:[%s2240_s1 + $0x168] sm:$0xff]  ;;  %v91_v27 = vld [vmem:[%s2240_s1 + $0x1f0] sm:$0xff]  ;;  %v1553_v29 = vpack.c.bf16 %v42_v18, %v41_v15  ;;  %v1555_v32 = vpack.c.bf16 %v60_v24, %v59_v23 }
  0x15   :  { %1546 = vmatpush3.bf16.msra.mxu0 %v1545_v0  ;;  %v101_v25 = vrot.slane %v28_v20, %v100_v10  ;;  %v109_v26 = vrot.slane %v28_v20, %v108_v11  ;;  %v92_v28 = vld [vmem:[%s2240_s1 + $0x1f8] sm:$0xff]  ;;  %v43_v30 = vld [vmem:[%s2240_s1 + $0x70] sm:$0xff]  ;;  %v1585_v31 = vpack.c.bf16 %v74_v22, %v73_v19 }
  0x16   :  { %1548 = vmatprep.subr.bf16.mxu0 %v1547_v2  ;;  %v44_v33 = vld [vmem:[%s2240_s1 + $0x78] sm:$0xff]  ;;  %v75_v34 = vld [vmem:[%s2240_s1 + $0x170] sm:$0xff] }
  0x17   :  { %1578 = vmatpush3.bf16.msra.mxu1 %v1577_v1  ;;  %178 = vmatprep.mubr.f32.mxu0 %v101_v25 }
  0x18   :  { %1580 = vmatprep.subr.bf16.mxu1 %v1579_v6 }
  0x19   :  { %1550 = vmatpush3.bf16.msra.mxu0 %v1549_v14 }
  0x1a   :  { %1552 = vmatprep.subr.bf16.mxu0 %v1551_v17 }
  0x1b   :  { %1582 = vmatpush3.bf16.msra.mxu1 %v1581_v16 }
  0x1c   :  { %10 = vsyncpa [#allocation5], 0  ;;  %1584 = vmatprep.subr.bf16.mxu1 %v1583_v21  ;;  %v1587_v35 = vpack.c.bf16 %v92_v28, %v91_v27  ;;  %v76_v36 = vld [vmem:[%s2240_s1 + $0x178] sm:$0xff]  ;;  %248 = vmatprep.mubr.f32.mxu1 %v109_v26  ;;  %v255_v37 = vld [vmem:[%s2241_s2 + $0x8] sm:$0xff]  ;;  %v96_v39 = vsub.s32 0, %v1860_v61  ;;  %v1557_v42 = vpack.c.bf16 %v44_v33, %v43_v30  ;;  %v104_v43 = vsub.s32 2, %v1860_v61 }
  0x1d   :  { %v261_v38 = vld [vmem:[%s2241_s2 + $0x38] sm:$0xff]  ;;  %v263_v41 = vld [vmem:[%s2241_s2 + $0x48] sm:$0xff]  ;;  %1554 = vmatpush3.bf16.msra.mxu0 %v1553_v29  ;;  %v1589_v44 = vpack.c.bf16 %v76_v36, %v75_v34  ;;  %v254_v46 = vld [vmem:[%s2241_s2] sm:$0xff]  ;;  %v1691_v22 = vmov 0.0   ;;  %vm321_vm0 = vcmask 392192   ;;  %vm587_vm1 = vcmp.lt.s32.totalorder %v94_v47, 768 }
  0x1e   :  { %v257_v40 = vld [vmem:[%s2241_s2 + $0x18] sm:$0xff]  ;;  %1556 = vmatprep.subr.bf16.mxu0 %v1555_v32  ;;  %v1591_v45 = vpack.c.bf16 %v261_v38, %v255_v37  ;;  %v260_v48 = vld [vmem:[%s2241_s2 + $0x30] sm:$0xff]  ;;  %v262_v51 = vld [vmem:[%s2241_s2 + $0x40] sm:$0xff]  ;;  %v97_v54 = vrot.slane %v28_v20, %v96_v39  ;;  %v105_v55 = vrot.slane %v28_v20, %v104_v43  ;;  %vm591_vm2 = vcmask 122880   ;;  %s1694_s17 = smov 112   ;;  %s1695_s18 = smov 64  }
  0x1f   :  { %1586 = vmatpush3.bf16.msra.mxu1 %v1585_v31  ;;  %v256_v49 = vld [vmem:[%s2241_s2 + $0x10] sm:$0xff]  ;;  %v1603_v50 = vpack.c.bf16 %v263_v41, %v257_v40  ;;  %v267_v52 = vld [vmem:[%s2241_s2 + $0x68] sm:$0xff]  ;;  %v273_v53 = vld [vmem:[%s2241_s2 + $0x98] sm:$0xff]  ;;  %v1593_v56 = vpack.c.bf16 %v260_v48, %v254_v46  ;;  %s1696_s19 = smov 96   ;;  %s1697_s20 = smov 32   ;;  %vm1029_vm3 = vcmask 130048  }
  0x20   :  { %1588 = vmatprep.subr.bf16.mxu1 %v1587_v35  ;;  %v1605_v57 = vpack.c.bf16 %v262_v51, %v256_v49  ;;  %v1595_v58 = vpack.c.bf16 %v273_v53, %v267_v52  ;;  %v266_v59 = vld [vmem:[%s2241_s2 + $0x60] sm:$0xff]  ;;  %v272_v60 = vld [vmem:[%s2241_s2 + $0x90] sm:$0xff]  ;;  %v269_v62 = vld [vmem:[%s2241_s2 + $0x78] sm:$0xff]  ;;  %v1692_v51 = vmov 1966171168   ;;  %s1698_s21 = smov 48  }
  0x21   :  { %1558 = vmatpush3.bf16.msra.mxu0 %v1557_v42  ;;  %v1597_v63 = vpack.c.bf16 %v272_v60, %v266_v59  ;;  %v275_v0 = vld [vmem:[%s2241_s2 + $0xa8] sm:$0xff]  ;;  %v268_v1 = vld [vmem:[%s2241_s2 + $0x70] sm:$0xff]  ;;  %v274_v2 = vld [vmem:[%s2241_s2 + $0xa0] sm:$0xff]  ;;  %v548_v52 = vunpack.c.l.s4 %v1692_v51  ;;  %s1699_s22 = smov 16   ;;  %vm1254_vm4 = vcmask 523264  }
  0x22   :  { %1592 = vmatprep.subr.bf16.mxu0 %v1591_v45  ;;  %v1607_v3 = vpack.c.bf16 %v275_v0, %v269_v62  ;;  %v1609_v4 = vpack.c.bf16 %v274_v2, %v268_v1  ;;  %v279_v5 = vld [vmem:[%s2241_s2 + $0xc8] sm:$0xff]  ;;  %v285_v6 = vld [vmem:[%s2241_s2 + $0xf8] sm:$0xff]  ;;  %v278_v8 = vld [vmem:[%s2241_s2 + $0xc0] sm:$0xff] }
  0x23   :  { %1590 = vmatpush3.bf16.msra.mxu1 %v1589_v44  ;;  %v1599_v7 = vpack.c.bf16 %v285_v6, %v279_v5  ;;  %v284_v9 = vld [vmem:[%s2241_s2 + $0xf0] sm:$0xff]  ;;  %v281_v12 = vld [vmem:[%s2241_s2 + $0xd8] sm:$0xff]  ;;  %v287_v14 = vld [vmem:[%s2241_s2 + $0x108] sm:$0xff]  ;;  %v313_v6 = vsub.s32 5, %v1860_v61 }
  0x24   :  { %1604 = vmatprep.subr.bf16.mxu1 %v1603_v50  ;;  %179 = vmatmul.mubr.f32.vlgmr.msra.gmra.mrb[0].mxu0 %v97_v54  ;;  %v1601_v13 = vpack.c.bf16 %v284_v9, %v278_v8  ;;  %v280_v15 = vld [vmem:[%s2241_s2 + $0xd0] sm:$0xff]  ;;  %v286_v16 = vld [vmem:[%s2241_s2 + $0x100] sm:$0xff]  ;;  %v1611_v17 = vpack.c.bf16 %v287_v14, %v281_v12  ;;  %v259_v19 = vld [vmem:[%s2241_s2 + $0x28] sm:$0xff] }
  0x25   :  { %1594 = vmatpush1.bf16.msra.mxu0 %v1593_v56  ;;  %v1613_v18 = vpack.c.bf16 %v286_v16, %v280_v15  ;;  %v265_v20 = vld [vmem:[%s2241_s2 + $0x58] sm:$0xff]  ;;  %389 = vmatprep.mubr.f32.mxu0 %v1691_v22  ;;  %v21_v24 = vld [vmem:[%s2243_s4] sm:$0x1]  ;;  %v264_v30 = vld [vmem:[%s2241_s2 + $0x50] sm:$0xff]  ;;  %v549_v56 = vunpack.c.0.s8 %v548_v52 }
  0x26   :  { %249 = vmatmul.mubr.f32.vlgmr.msra.gmra.mrb[0].mxu1 %v105_v55  ;;  %1596 = vmatprep.subr.bf16.mxu0 %v1595_v58  ;;  %v1615_v21 = vpack.c.bf16 %v265_v20, %v259_v19  ;;  %v258_v29 = vld [vmem:[%s2241_s2 + $0x20] sm:$0xff]  ;;  %v271_v32 = vld [vmem:[%s2241_s2 + $0x88] sm:$0xff]  ;;  %v277_v33 = vld [vmem:[%s2241_s2 + $0xb8] sm:$0xff] }
  0x27   :  { %1606 = vmatpush1.bf16.msra.mxu1 %v1605_v57  ;;  %460 = vmatprep.mubr.f32.mxu1 %v1691_v22  ;;  %v1617_v35 = vpack.c.bf16 %v264_v30, %v258_v29  ;;  %v1619_v37 = vpack.c.bf16 %v277_v33, %v271_v32  ;;  %v270_v38 = vld [vmem:[%s2241_s2 + $0x80] sm:$0xff]  ;;  %v276_v40 = vld [vmem:[%s2241_s2 + $0xb0] sm:$0xff]  ;;  %v283_v41 = vld [vmem:[%s2241_s2 + $0xe8] sm:$0xff]  ;;  %v552_v2 = vsub.s32 %v549_v56, %v1860_v61 }
  0x28   :  { %1608 = vmatprep.subr.bf16.mxu1 %v1607_v3  ;;  %v289_v42 = vld [vmem:[%s2241_s2 + $0x118] sm:$0xff]  ;;  %v1621_v44 = vpack.c.bf16 %v276_v40, %v270_v38  ;;  %v282_v46 = vld [vmem:[%s2241_s2 + $0xe0] sm:$0xff]  ;;  %v288_v48 = vld [vmem:[%s2241_s2 + $0x110] sm:$0xff]  ;;  %s1693_s2 = smov 80  }
  0x29   :  { %1598 = vmatpush1.bf16.msra.mxu0 %v1597_v63  ;;  %v1623_v45 = vpack.c.bf16 %v289_v42, %v283_v41  ;;  %v1625_v49 = vpack.c.bf16 %v288_v48, %v282_v46  ;;  %v22_v50 = vld [vmem:[%s2243_s4 + $0x1] sm:$0x3f] }
  0x2a   :  { %1600 = vmatprep.subr.bf16.mxu0 %v1599_v7  ;;  %v294_v53 = vrot.slane %v22_v50, %v96_v39  ;;  %v302_v54 = vrot.slane %v22_v50, %v104_v43  ;;  %v298_v55 = vrot.slane %v22_v50, %v100_v10  ;;  %v306_v57 = vrot.slane %v22_v50, %v108_v11 }
  0x2b   :  { %1610 = vmatpush1.bf16.msra.mxu1 %v1609_v4  ;;  %v309_v43 = vsub.s32 4, %v1860_v61  ;;  %v314_v8 = vrot.slane %v22_v50, %v313_v6 }
  0x2c   :  { %1612 = vmatprep.subr.bf16.mxu1 %v1611_v17 }
  0x2d   :  { %1602 = vmatpush1.bf16.msra.mxu0 %v1601_v13  ;;  %v310_v11 = vrot.slane %v22_v50, %v309_v43 }
  0x2e   :  { %1616 = vmatprep.subr.bf16.mxu0 %v1615_v21 }
  0x2f   :  { %1614 = vmatpush1.bf16.msra.mxu1 %v1613_v18 }
  0xf7   :  { %v1468_v23 = vpop.f32.mrb[0].mxu0 }
  0xf8   :  { %v1469_v25 = vpop.f32.mrb[1].mxu0 }
  0xf9   :  { %v1503_v26 = vpop.f32.mrb[0].mxu1  ;;  %v1470_v27 = vadd.f32 %v1469_v25, %v1468_v23 }
  0xfa   :  { %v1504_v28 = vpop.f32.mrb[1].mxu1 }
  0xfb   :  { %v1505_v31 = vadd.f32 %v1504_v28, %v1503_v26  ;;  %v181_v34 = vadd.f32 %v1470_v27, %v21_v24 }
  0xfd   :  { %v251_v36 = vadd.f32 %v1505_v31, %v181_v34 }
  0xff   :  { %1380 = vmatmul.mubr.msk.f32.vlgmr.msra.gmra.mrb[2].mxu0 %vm321_vm0, %v251_v36  ;;  %1381 = vmatmul.mubr.msk.f32.vlgmr.msra.gmra.mrb[2].mxu1 %vm321_vm0, %v251_v36 }
 0x100   :  { %1618 = vmatpush1.bf16.msra.mxu0 %v1617_v35  ;;  %531 = vmatprep.mubr.f32.mxu0 %v1691_v22 }
 0x101   :  { %1620 = vmatprep.subr.bf16.mxu0 %v1619_v37 }
 0x104   :  { %1622 = vmatpush1.bf16.msra.mxu0 %v1621_v44 }
 0x105   :  { %1624 = vmatprep.subr.bf16.mxu0 %v1623_v45 }
 0x108   :  { %1626 = vmatpush1.bf16.msra.mxu0 %v1625_v49 }
 0x10b   :  { %1382 = vmatmul.mubr.msk.f32.vlgmr.msra.gmra.mrb[4].mxu0 %vm321_vm0, %v251_v36 }
 0x1d2   :  { %v391_v58 = vpop.f32.mrb[2].mxu0  ;;  %v462_v59 = vpop.f32.mrb[2].mxu1 }
 0x1d3   :  { %v392_v60 = vadd.f32 %v391_v58, %v294_v53  ;;  %v463_v62 = vadd.f32 %v462_v59, %v302_v54  ;;  %v393_v63 = vpop.f32.mrb[3].mxu0  ;;  %v464_v0 = vpop.f32.mrb[3].mxu1 }
 0x1d4   :  { %v394_v1 = vadd.f32 %v393_v63, %v298_v55  ;;  %v465_v39 = vadd.f32 %v464_v0, %v306_v57 }
 0x1d6   :  { %v544_v3 = vcombine.low %v392_v60, %v394_v1  ;;  %v545_v4 = vcombine.low %v463_v62, %v465_v39 }
 0x1d8   :  { %v553_v5 = vrot.slane %v544_v3, %v552_v2  ;;  %v560_v10 = vrot.slane %v545_v4, %v552_v2 }
 0x1da   :  { %v568_v7 = vcombine.low %v553_v5, %v560_v10 }
 0x1dc   :  { %v575_v17 = vrot.slane %v568_v7, %v552_v2 }
 0x1de   :  { %v533_v9 = vpop.f32.mrb[4].mxu0 }
 0x1df   :  { %v534_v12 = vadd.f32 %v533_v9, %v310_v11  ;;  %v535_v13 = vpop.f32.mrb[5].mxu0 }
 0x1e0   :  { %v536_v14 = vadd.f32 %v535_v13, %v314_v8 }
 0x1e2   :  { %v546_v15 = vcombine.low %v534_v12, %v536_v14 }
 0x1e4   :  { %v567_v16 = vrot.slane %v546_v15, %v552_v2 }
 0x1e6   :  { %v582_v18 = vrot.slane %v567_v16, %v552_v2 }
 0x1e8   :  { %v583_v19 = vcombine.low %v575_v17, %v582_v18 }
 0x1ea   :  { %589 = vst.msk [vmem:[#allocation2] sm:$0x3f] %vm587_vm1, %v583_v19 }
 0x1f1   :  { %v1385_v20 = vld [vmem:[#allocation2] ss:$0 sm:$0xff]  ;;  %v663_v21 = vld [vmem:[#allocation2 + $0x1] sm:$0x1]  ;;  %v735_v22 = vld [vmem:[#allocation2 + $0x2] sm:$0x1] }
 0x1f2   :  { %619 = vrot.lane.b32.xlu1 %v1385_v20, %s1693_s2  ;;  %599 = vrot.lane.b32.xlu0 %v1385_v20, %s1694_s17  ;;  %v590_v61 = vld [vmem:[#allocation2] sm:$0x1]  ;;  %664 = vst.msk [vmem:[#allocation3 + $0x8] sm:$0x1] %vm591_vm2, %v663_v21  ;;  %736 = vst.msk [vmem:[#allocation3 + $0x10] sm:$0x1] %vm591_vm2, %v735_v22 }
 0x1f3   :  { %592 = vst.msk [vmem:[#allocation3] sm:$0x1] %vm591_vm2, %v590_v61  ;;  %v807_v47 = vld [vmem:[#allocation2 + $0x3] sm:$0x1]  ;;  %v879_v23 = vld [vmem:[#allocation2 + $0x4] sm:$0x1] }
 0x1f4   :  { %v951_v24 = vld [vmem:[#allocation2 + $0x5] sm:$0x1]  ;;  %808 = vst.msk [vmem:[#allocation3 + $0x18] sm:$0x1] %vm591_vm2, %v807_v47  ;;  %880 = vst.msk [vmem:[#allocation3 + $0x20] sm:$0x1] %vm591_vm2, %v879_v23 }
 0x1f5   :  { %952 = vst.msk [vmem:[#allocation3 + $0x28] sm:$0x1] %vm591_vm2, %v951_v24  ;;  %v1390_v25 = vld [vmem:[#allocation2 + $0x1] ss:$0 sm:$0xff]  ;;  %v1398_v26 = vld [vmem:[#allocation2 + $0x2] ss:$0 sm:$0xff] }
 0x1f6   :  { %629 = vrot.lane.b32.xlu1 %v1385_v20, %s1695_s18  ;;  %609 = vrot.lane.b32.xlu0 %v1385_v20, %s1696_s19  ;;  %v1404_v27 = vld [vmem:[#allocation2 + $0x3] ss:$0 sm:$0xff]  ;;  %v1412_v28 = vld [vmem:[#allocation2 + $0x4] ss:$0 sm:$0xff]  ;;  %v1418_v29 = vld [vmem:[#allocation2 + $0x5] ss:$0 sm:$0xff] }
 0x1fa   :  { %649 = vrot.lane.b32.xlu1 %v1385_v20, %s1697_s20  ;;  %639 = vrot.lane.b32.xlu0 %v1385_v20, %s1698_s21 }
 0x1fe   :  { %671 = vrot.lane.b32.xlu1 %v1390_v25, %s1694_s17  ;;  %659 = vrot.lane.b32.xlu0 %v1385_v20, %s1699_s22 }
 0x202   :  { %691 = vrot.lane.b32.xlu1 %v1390_v25, %s1693_s2  ;;  %681 = vrot.lane.b32.xlu0 %v1390_v25, %s1696_s19 }
 0x206   :  { %711 = vrot.lane.b32.xlu1 %v1390_v25, %s1698_s21  ;;  %701 = vrot.lane.b32.xlu0 %v1390_v25, %s1695_s18 }
 0x20a   :  { %731 = vrot.lane.b32.xlu1 %v1390_v25, %s1699_s22  ;;  %721 = vrot.lane.b32.xlu0 %v1390_v25, %s1697_s20 }
 0x20e   :  { %753 = vrot.lane.b32.xlu1 %v1398_v26, %s1696_s19  ;;  %743 = vrot.lane.b32.xlu0 %v1398_v26, %s1694_s17 }
 0x212   :  { %773 = vrot.lane.b32.xlu1 %v1398_v26, %s1695_s18  ;;  %763 = vrot.lane.b32.xlu0 %v1398_v26, %s1693_s2 }
 0x216   :  { %793 = vrot.lane.b32.xlu1 %v1398_v26, %s1697_s20  ;;  %783 = vrot.lane.b32.xlu0 %v1398_v26, %s1698_s21 }
 0x21a   :  { %815 = vrot.lane.b32.xlu1 %v1404_v27, %s1694_s17  ;;  %803 = vrot.lane.b32.xlu0 %v1398_v26, %s1699_s22 }
 0x21e   :  { %835 = vrot.lane.b32.xlu1 %v1404_v27, %s1693_s2  ;;  %825 = vrot.lane.b32.xlu0 %v1404_v27, %s1696_s19 }
 0x222   :  { %855 = vrot.lane.b32.xlu1 %v1404_v27, %s1698_s21  ;;  %845 = vrot.lane.b32.xlu0 %v1404_v27, %s1695_s18 }
 0x226   :  { %875 = vrot.lane.b32.xlu1 %v1404_v27, %s1699_s22  ;;  %865 = vrot.lane.b32.xlu0 %v1404_v27, %s1697_s20 }
 0x22a   :  { %897 = vrot.lane.b32.xlu1 %v1412_v28, %s1696_s19  ;;  %887 = vrot.lane.b32.xlu0 %v1412_v28, %s1694_s17 }
 0x22e   :  { %917 = vrot.lane.b32.xlu1 %v1412_v28, %s1695_s18  ;;  %907 = vrot.lane.b32.xlu0 %v1412_v28, %s1693_s2 }
 0x232   :  { %937 = vrot.lane.b32.xlu1 %v1412_v28, %s1697_s20  ;;  %927 = vrot.lane.b32.xlu0 %v1412_v28, %s1698_s21 }
 0x236   :  { %959 = vrot.lane.b32.xlu1 %v1418_v29, %s1694_s17  ;;  %947 = vrot.lane.b32.xlu0 %v1412_v28, %s1699_s22 }
 0x23a   :  { %979 = vrot.lane.b32.xlu1 %v1418_v29, %s1693_s2  ;;  %969 = vrot.lane.b32.xlu0 %v1418_v29, %s1696_s19 }
 0x23e   :  { %999 = vrot.lane.b32.xlu1 %v1418_v29, %s1698_s21  ;;  %989 = vrot.lane.b32.xlu0 %v1418_v29, %s1695_s18 }
 0x242   :  { %1019 = vrot.lane.b32.xlu1 %v1418_v29, %s1699_s22  ;;  %1009 = vrot.lane.b32.xlu0 %v1418_v29, %s1697_s20 }
 0x264   :  { %v620_v30 = vpop.permute.xlu1 %619  ;;  %v600_v31 = vpop.permute.xlu0 %599 }
 0x265   :  { %622 = vst.msk [vmem:[#allocation3 + $0x3] sm:$0x1] %vm591_vm2, %v620_v30  ;;  %602 = vst.msk [vmem:[#allocation3 + $0x1] sm:$0x1] %vm591_vm2, %v600_v31 }
 0x268   :  { %v630_v32 = vpop.permute.xlu1 %629  ;;  %v610_v33 = vpop.permute.xlu0 %609 }
 0x269   :  { %632 = vst.msk [vmem:[#allocation3 + $0x4] sm:$0x1] %vm591_vm2, %v630_v32  ;;  %612 = vst.msk [vmem:[#allocation3 + $0x2] sm:$0x1] %vm591_vm2, %v610_v33 }
 0x26c   :  { %v650_v34 = vpop.permute.xlu1 %649  ;;  %v640_v35 = vpop.permute.xlu0 %639 }
 0x26d   :  { %652 = vst.msk [vmem:[#allocation3 + $0x6] sm:$0x1] %vm591_vm2, %v650_v34  ;;  %642 = vst.msk [vmem:[#allocation3 + $0x5] sm:$0x1] %vm591_vm2, %v640_v35 }
 0x270   :  { %v672_v36 = vpop.permute.xlu1 %671  ;;  %v660_v37 = vpop.permute.xlu0 %659 }
 0x271   :  { %674 = vst.msk [vmem:[#allocation3 + $0x9] sm:$0x1] %vm591_vm2, %v672_v36  ;;  %662 = vst.msk [vmem:[#allocation3 + $0x7] sm:$0x1] %vm591_vm2, %v660_v37 }
 0x274   :  { %v692_v38 = vpop.permute.xlu1 %691  ;;  %v682_v40 = vpop.permute.xlu0 %681 }
 0x275   :  { %694 = vst.msk [vmem:[#allocation3 + $0xb] sm:$0x1] %vm591_vm2, %v692_v38  ;;  %684 = vst.msk [vmem:[#allocation3 + $0xa] sm:$0x1] %vm591_vm2, %v682_v40 }
 0x278   :  { %v712_v41 = vpop.permute.xlu1 %711  ;;  %v702_v42 = vpop.permute.xlu0 %701  ;;  %v2130_v44 = vld [vmem:[#allocation3] sm:$0xff] }
 0x279   :  { %714 = vst.msk [vmem:[#allocation3 + $0xd] sm:$0x1] %vm591_vm2, %v712_v41  ;;  %704 = vst.msk [vmem:[#allocation3 + $0xc] sm:$0x1] %vm591_vm2, %v702_v42  ;;  %v1030_v45 = vsel %vm1029_vm3, %v2130_v44, 0.0  ;;  %v1133_v41 = vld [vmem:[%s2242_s3] sm:$0xff] }
 0x27a   :  { %1031 = vadd.xlane.f32.xlu0 %v1030_v45  ;;  %v1134_v42 = vld [vmem:[%s2242_s3 + $0x8] sm:$0xff] }
 0x27c   :  { %v732_v46 = vpop.permute.xlu1 %731  ;;  %v722_v48 = vpop.permute.xlu0 %721 }
 0x27d   :  { %734 = vst.msk [vmem:[#allocation3 + $0xf] sm:$0x1] %vm591_vm2, %v732_v46  ;;  %724 = vst.msk [vmem:[#allocation3 + $0xe] sm:$0x1] %vm591_vm2, %v722_v48 }
 0x280   :  { %v754_v49 = vpop.permute.xlu1 %753  ;;  %v744_v50 = vpop.permute.xlu0 %743 }
 0x281   :  { %756 = vst.msk [vmem:[#allocation3 + $0x12] sm:$0x1] %vm591_vm2, %v754_v49  ;;  %746 = vst.msk [vmem:[#allocation3 + $0x11] sm:$0x1] %vm591_vm2, %v744_v50 }
 0x284   :  { %v774_v51 = vpop.permute.xlu1 %773  ;;  %v764_v52 = vpop.permute.xlu0 %763  ;;  %v2140_v53 = vld [vmem:[#allocation3 + $0x8] sm:$0xff] }
 0x285   :  { %776 = vst.msk [vmem:[#allocation3 + $0x14] sm:$0x1] %vm591_vm2, %v774_v51  ;;  %766 = vst.msk [vmem:[#allocation3 + $0x13] sm:$0x1] %vm591_vm2, %v764_v52  ;;  %v1033_v54 = vsel %vm1029_vm3, %v2140_v53, 0.0 }
 0x286   :  { %1034 = vadd.xlane.f32.xlu1 %v1033_v54 }
 0x288   :  { %v794_v55 = vpop.permute.xlu1 %793  ;;  %v784_v56 = vpop.permute.xlu0 %783 }
 0x289   :  { %796 = vst.msk [vmem:[#allocation3 + $0x16] sm:$0x1] %vm591_vm2, %v794_v55  ;;  %786 = vst.msk [vmem:[#allocation3 + $0x15] sm:$0x1] %vm591_vm2, %v784_v56 }
 0x28c   :  { %v816_v57 = vpop.permute.xlu1 %815  ;;  %v804_v58 = vpop.permute.xlu0 %803 }
 0x28d   :  { %818 = vst.msk [vmem:[#allocation3 + $0x19] sm:$0x1] %vm591_vm2, %v816_v57  ;;  %806 = vst.msk [vmem:[#allocation3 + $0x17] sm:$0x1] %vm591_vm2, %v804_v58 }
 0x290   :  { %v836_v59 = vpop.permute.xlu1 %835  ;;  %v826_v60 = vpop.permute.xlu0 %825 }
 0x291   :  { %838 = vst.msk [vmem:[#allocation3 + $0x1b] sm:$0x1] %vm591_vm2, %v836_v59  ;;  %828 = vst.msk [vmem:[#allocation3 + $0x1a] sm:$0x1] %vm591_vm2, %v826_v60 }
 0x294   :  { %v856_v62 = vpop.permute.xlu1 %855  ;;  %v846_v63 = vpop.permute.xlu0 %845  ;;  %v1025_v0 = vld [vmem:[#allocation3 + $0x10] sm:$0xff] }
 0x295   :  { %858 = vst.msk [vmem:[#allocation3 + $0x1d] sm:$0x1] %vm591_vm2, %v856_v62  ;;  %848 = vst.msk [vmem:[#allocation3 + $0x1c] sm:$0x1] %vm591_vm2, %v846_v63  ;;  %v1036_v1 = vsel %vm1029_vm3, %v1025_v0, 0.0 }
 0x296   :  { %1037 = vadd.xlane.f32.xlu0 %v1036_v1 }
 0x298   :  { %v876_v2 = vpop.permute.xlu1 %875  ;;  %v866_v39 = vpop.permute.xlu0 %865 }
 0x299   :  { %878 = vst.msk [vmem:[#allocation3 + $0x1f] sm:$0x1] %vm591_vm2, %v876_v2  ;;  %868 = vst.msk [vmem:[#allocation3 + $0x1e] sm:$0x1] %vm591_vm2, %v866_v39  ;;  %v1426_v2 = vld [vmem:[%s2243_s4 + $0x9] ss:$0 sm:$0xff] }
 0x29c   :  { %v898_v3 = vpop.permute.xlu1 %897  ;;  %v888_v4 = vpop.permute.xlu0 %887 }
 0x29d   :  { %900 = vst.msk [vmem:[#allocation3 + $0x22] sm:$0x1] %vm591_vm2, %v898_v3  ;;  %890 = vst.msk [vmem:[#allocation3 + $0x21] sm:$0x1] %vm591_vm2, %v888_v4 }
 0x2a0   :  { %v918_v43 = vpop.permute.xlu1 %917  ;;  %v908_v5 = vpop.permute.xlu0 %907  ;;  %v1026_v10 = vld [vmem:[#allocation3 + $0x18] sm:$0xff] }
 0x2a1   :  { %920 = vst.msk [vmem:[#allocation3 + $0x24] sm:$0x1] %vm591_vm2, %v918_v43  ;;  %910 = vst.msk [vmem:[#allocation3 + $0x23] sm:$0x1] %vm591_vm2, %v908_v5  ;;  %v1039_v6 = vsel %vm1029_vm3, %v1026_v10, 0.0 }
 0x2a2   :  { %1040 = vadd.xlane.f32.xlu0 %v1039_v6 }
 0x2a4   :  { %v938_v7 = vpop.permute.xlu1 %937  ;;  %v928_v11 = vpop.permute.xlu0 %927 }
 0x2a5   :  { %940 = vst.msk [vmem:[#allocation3 + $0x26] sm:$0x1] %vm591_vm2, %v938_v7  ;;  %930 = vst.msk [vmem:[#allocation3 + $0x25] sm:$0x1] %vm591_vm2, %v928_v11 }
 0x2a8   :  { %v960_v8 = vpop.permute.xlu1 %959  ;;  %v948_v9 = vpop.permute.xlu0 %947 }
 0x2a9   :  { %962 = vst.msk [vmem:[#allocation3 + $0x29] sm:$0x1] %vm591_vm2, %v960_v8  ;;  %950 = vst.msk [vmem:[#allocation3 + $0x27] sm:$0x1] %vm591_vm2, %v948_v9 }
 0x2ac   :  { %v980_v12 = vpop.permute.xlu1 %979  ;;  %v970_v13 = vpop.permute.xlu0 %969 }
 0x2ad   :  { %982 = vst.msk [vmem:[#allocation3 + $0x2b] sm:$0x1] %vm591_vm2, %v980_v12  ;;  %972 = vst.msk [vmem:[#allocation3 + $0x2a] sm:$0x1] %vm591_vm2, %v970_v13 }
 0x2b0   :  { %v1000_v14 = vpop.permute.xlu1 %999  ;;  %v990_v15 = vpop.permute.xlu0 %989  ;;  %v1027_v16 = vld [vmem:[#allocation3 + $0x20] sm:$0xff] }
 0x2b1   :  { %1002 = vst.msk [vmem:[#allocation3 + $0x2d] sm:$0x1] %vm591_vm2, %v1000_v14  ;;  %992 = vst.msk [vmem:[#allocation3 + $0x2c] sm:$0x1] %vm591_vm2, %v990_v15  ;;  %v1042_v17 = vsel %vm1029_vm3, %v1027_v16, 0.0 }
 0x2b2   :  { %1043 = vadd.xlane.f32.xlu1 %v1042_v17 }
 0x2b4   :  { %v1020_v18 = vpop.permute.xlu1 %1019  ;;  %v1010_v19 = vpop.permute.xlu0 %1009 }
 0x2b5   :  { %1022 = vst.msk [vmem:[#allocation3 + $0x2f] sm:$0x1] %vm591_vm2, %v1020_v18  ;;  %1012 = vst.msk [vmem:[#allocation3 + $0x2e] sm:$0x1] %vm591_vm2, %v1010_v19 }
 0x2bc   :  { %v1028_v20 = vld [vmem:[#allocation3 + $0x28] sm:$0xff] }
 0x2bd   :  { %v1045_v61 = vsel %vm1029_vm3, %v1028_v20, 0.0 }
 0x2be   :  { %1046 = vadd.xlane.f32.xlu0 %v1045_v61 }
 0x307   :  { %v1032_v21 = vpop.xlane.xlu0 %1031 }
 0x308   :  { %v1049_v22 = vmul.f32 0.0625, %v1032_v21 }
 0x30a   :  { %v1055_v47 = vsub.f32 %v2130_v44, %v1049_v22  ;;  %v1627_v44 = vpack.c.bf16 %v1134_v42, %v1133_v41 }
 0x30c   :  { %v1061_v23 = vmul.f32 %v1055_v47, %v1055_v47  ;;  %1628 = vmatprep.subr.bf16.mxu1 %v1627_v44 }
 0x30d   :  { %1630 = vmatpush3.bf16.msra.mxu1 %v1627_v44 }
 0x30e   :  { %v1067_v24 = vsel %vm1029_vm3, %v1061_v23, 0.0 }
 0x30f   :  { %1068 = vadd.xlane.f32.xlu1 %v1067_v24 }
 0x313   :  { %v1035_v25 = vpop.xlane.xlu1 %1034 }
 0x314   :  { %v1050_v26 = vmul.f32 0.0625, %v1035_v25 }
 0x316   :  { %v1056_v27 = vsub.f32 %v2140_v53, %v1050_v26 }
 0x318   :  { %v1062_v28 = vmul.f32 %v1056_v27, %v1056_v27 }
 0x31a   :  { %v1070_v29 = vsel %vm1029_vm3, %v1062_v28, 0.0 }
 0x31b   :  { %1071 = vadd.xlane.f32.xlu0 %v1070_v29 }
 0x323   :  { %v1038_v30 = vpop.xlane.xlu0 %1037 }
 0x324   :  { %v1051_v31 = vmul.f32 0.0625, %v1038_v30 }
 0x326   :  { %v1057_v32 = vsub.f32 %v1025_v0, %v1051_v31  ;;  %v1425_v0 = vld [vmem:[%s2243_s4 + $0x8] ss:$0 sm:$0xff] }
 0x328   :  { %v1063_v33 = vmul.f32 %v1057_v32, %v1057_v32 }
 0x32a   :  { %v1073_v34 = vsel %vm1029_vm3, %v1063_v33, 0.0  ;;  %v1427_v33 = vld [vmem:[%s2243_s4 + $0x7] ss:$0 sm:$0xff] }
 0x32b   :  { %1074 = vadd.xlane.f32.xlu1 %v1073_v34 }
 0x32f   :  { %v1041_v35 = vpop.xlane.xlu0 %1040 }
 0x330   :  { %v1052_v36 = vmul.f32 0.0625, %v1041_v35 }
 0x332   :  { %v1058_v37 = vsub.f32 %v1026_v10, %v1052_v36 }
 0x334   :  { %v1064_v38 = vmul.f32 %v1058_v37, %v1058_v37 }
 0x336   :  { %v1076_v40 = vsel %vm1029_vm3, %v1064_v38, 0.0 }
 0x337   :  { %1077 = vadd.xlane.f32.xlu0 %v1076_v40 }
 0x33f   :  { %v1044_v45 = vpop.xlane.xlu1 %1043 }
 0x340   :  { %v1053_v46 = vmul.f32 0.0625, %v1044_v45 }
 0x342   :  { %v1059_v48 = vsub.f32 %v1027_v16, %v1053_v46 }
 0x344   :  { %v1065_v49 = vmul.f32 %v1059_v48, %v1059_v48 }
 0x346   :  { %v1079_v50 = vsel %vm1029_vm3, %v1065_v49, 0.0 }
 0x347   :  { %1080 = vadd.xlane.f32.xlu1 %v1079_v50 }
 0x34b   :  { %v1047_v51 = vpop.xlane.xlu0 %1046 }
 0x34c   :  { %v1054_v52 = vmul.f32 0.0625, %v1047_v51 }
 0x34e   :  { %v1060_v53 = vsub.f32 %v1028_v20, %v1054_v52 }
 0x350   :  { %v1066_v54 = vmul.f32 %v1060_v53, %v1060_v53 }
 0x352   :  { %v1082_v55 = vsel %vm1029_vm3, %v1066_v54, 0.0 }
 0x353   :  { %1083 = vadd.xlane.f32.xlu0 %v1082_v55 }
 0x39c   :  { %v1069_v56 = vpop.xlane.xlu1 %1068 }
 0x39d   :  { %v1085_v57 = vmul.f32 0.0625, %v1069_v56 }
 0x39f   :  { %v1091_v58 = vadd.f32 1e-05, %v1085_v57 }
 0x3a1   :  { %1643 = vrsqrt.f32 %v1091_v58 }
 0x3a8   :  { %v1072_v59 = vpop.xlane.xlu0 %1071 }
 0x3a9   :  { %v1086_v60 = vmul.f32 0.0625, %v1072_v59 }
 0x3ab   :  { %v1644_v62 = vpop.eup %1643  ;;  %v1092_v63 = vadd.f32 1e-05, %v1086_v60 }
 0x3ac   :  { %v1103_v1 = vmul.f32 %v1644_v62, %v1055_v47 }
 0x3ad   :  { %1645 = vrsqrt.f32 %v1092_v63 }
 0x3ae   :  { %v1115_v39 = vmul.f32 %v1425_v0, %v1103_v1 }
 0x3b0   :  { %v1127_v3 = vadd.f32 %v1426_v2, %v1115_v39 }
 0x3b2   :  { %1518 = vmatprep.mubr.msk.f32.mxu1 %vm1029_vm3, %v1127_v3 }
 0x3b7   :  { %v1646_v4 = vpop.eup %1645 }
 0x3b8   :  { %v1104_v43 = vmul.f32 %v1646_v4, %v1056_v27  ;;  %v1075_v5 = vpop.xlane.xlu1 %1074 }
 0x3b9   :  { %v1087_v10 = vmul.f32 0.0625, %v1075_v5 }
 0x3ba   :  { %v1116_v6 = vmul.f32 %v1425_v0, %v1104_v43 }
 0x3bb   :  { %v1093_v7 = vadd.f32 1e-05, %v1087_v10 }
 0x3bc   :  { %v1128_v11 = vadd.f32 %v1426_v2, %v1116_v6 }
 0x3bd   :  { %1647 = vrsqrt.f32 %v1093_v7 }
 0x3be   :  { %1519 = vmatmul.mubr.msk.f32.vlgmr.msra.gmra.mrb[4].mxu1 %vm1029_vm3, %v1128_v11 }
 0x3c4   :  { %v1078_v8 = vpop.xlane.xlu0 %1077 }
 0x3c5   :  { %v1088_v9 = vmul.f32 0.0625, %v1078_v8 }
 0x3c7   :  { %v1648_v12 = vpop.eup %1647  ;;  %v1094_v13 = vadd.f32 1e-05, %v1088_v9 }
 0x3c8   :  { %v1105_v14 = vmul.f32 %v1648_v12, %v1057_v32 }
 0x3c9   :  { %1649 = vrsqrt.f32 %v1094_v13 }
 0x3ca   :  { %v1117_v15 = vmul.f32 %v1425_v0, %v1105_v14 }
 0x3cc   :  { %v1129_v16 = vadd.f32 %v1426_v2, %v1117_v15 }
 0x3ce   :  { %1521 = vmatprep.mubr.msk.f32.mxu1 %vm1029_vm3, %v1129_v16 }
 0x3d3   :  { %v1650_v17 = vpop.eup %1649 }
 0x3d4   :  { %v1081_v18 = vpop.xlane.xlu1 %1080  ;;  %v1106_v19 = vmul.f32 %v1650_v17, %v1058_v37 }
 0x3d5   :  { %v1089_v20 = vmul.f32 0.0625, %v1081_v18 }
 0x3d6   :  { %v1118_v61 = vmul.f32 %v1425_v0, %v1106_v19 }
 0x3d7   :  { %v1095_v21 = vadd.f32 1e-05, %v1089_v20 }
 0x3d8   :  { %v1130_v22 = vadd.f32 %v1426_v2, %v1118_v61 }
 0x3d9   :  { %1651 = vrsqrt.f32 %v1095_v21 }
 0x3da   :  { %1522 = vmatmul.mubr.msk.f32.gmra.mrb[6].mxu1 %vm1029_vm3, %v1130_v22 }
 0x3e0   :  { %v1084_v47 = vpop.xlane.xlu0 %1083 }
 0x3e1   :  { %v1090_v23 = vmul.f32 0.0625, %v1084_v47 }
 0x3e3   :  { %v1652_v24 = vpop.eup %1651  ;;  %v1096_v25 = vadd.f32 1e-05, %v1090_v23 }
 0x3e4   :  { %v1107_v26 = vmul.f32 %v1652_v24, %v1059_v48 }
 0x3e5   :  { %1653 = vrsqrt.f32 %v1096_v25  ;;  %v1434_v25 = vld [vmem:[%s2243_s4 + $0xa] ss:$0 sm:$0xff] }
 0x3e6   :  { %v1119_v27 = vmul.f32 %v1425_v0, %v1107_v26 }
 0x3e8   :  { %v1131_v28 = vadd.f32 %v1426_v2, %v1119_v27 }
 0x3ea   :  { %1524 = vmatprep.mubr.msk.f32.mxu1 %vm1029_vm3, %v1131_v28  ;;  %v1435_v28 = vld [vmem:[%s2243_s4 + $0xb] ss:$0 sm:$0xff]  ;;  %s1700_s4 = smov [#allocation4]  }
 0x3eb   :  { %s1369_s10 = sshll.u32 %s1700_s4, 4  ;;  %s1370_s10 = int_to_ptr.vmem [resolvable:$true] %s1369_s10 }
 0x3ec   :  { %s1667_s0 = scalar_lea.vmem %s1370_s10, 768  ;;  %p1672_p1 = scmp.lt.s32.totalorder %s1370_s10, %s1370_s10 }
 0x3ed   :  { %p1668_p0 = scmp.ne.s32.totalorder %s1370_s10, %s1667_s0  ;;  %p1673_p2 = scmp.lt.s32.totalorder %s1667_s0, %s1667_s0 }
 0x3ef   :  { %v1654_v29 = vpop.eup %1653  ;;  %p1674_p3 = por %p1673_p2, %p1672_p1 }
 0x3f0   :  { %v1108_v30 = vmul.f32 %v1654_v29, %v1060_v53 }
 0x3f1   :  { %p1675_p4 = pnand %p1674_p3, %p1668_p0 }
 0x3f2   :  { %v1120_v31 = vmul.f32 %v1425_v0, %v1108_v30 }
 0x3f4   :  { %v1132_v32 = vadd.f32 %v1426_v2, %v1120_v31 }
 0x3f6   :  { %1525 = vmatmul.mubr.msk.f32.gmra.mrb[8].mxu1 %vm1029_vm3, %v1132_v32 }
 0x491   :  { %v1520_v34 = vpop.f32.mrb[4].mxu1 }
 0x492   :  { %v1231_v35 = vadd.f32 %v1520_v34, %v1427_v33  ;;  %v1225_v36 = vpop.f32.mrb[5].mxu1 }
 0x493   :  { %v1226_v37 = vadd.f32 %v1427_v33, %v1225_v36 }
 0x494   :  { %v1258_v38 = vsel %vm1254_vm4, %v1231_v35, 0.0 }
 0x495   :  { %1259 = vadd.xlane.f32.xlu0 %v1258_v38  ;;  %v1255_v40 = vsel %vm1254_vm4, %v1226_v37, 0.0 }
 0x496   :  { %1256 = vadd.xlane.f32.xlu1 %v1255_v40 }
 0x4ad   :  { %v1523_v41 = vpop.f32.mrb[6].mxu1 }
 0x4ae   :  { %v1241_v42 = vadd.f32 %v1523_v41, %v1427_v33  ;;  %v1235_v44 = vpop.f32.mrb[7].mxu1 }
 0x4af   :  { %v1236_v45 = vadd.f32 %v1427_v33, %v1235_v44 }
 0x4b0   :  { %v1264_v46 = vsel %vm1254_vm4, %v1241_v42, 0.0 }
 0x4b1   :  { %1265 = vadd.xlane.f32.xlu0 %v1264_v46  ;;  %v1261_v48 = vsel %vm1254_vm4, %v1236_v45, 0.0 }
 0x4b2   :  { %1262 = vadd.xlane.f32.xlu1 %v1261_v48 }
 0x4c9   :  { %v1526_v49 = vpop.f32.mrb[8].mxu1 }
 0x4ca   :  { %v1251_v50 = vadd.f32 %v1526_v49, %v1427_v33  ;;  %v1245_v51 = vpop.f32.mrb[9].mxu1 }
 0x4cb   :  { %v1246_v52 = vadd.f32 %v1427_v33, %v1245_v51 }
 0x4cc   :  { %v1270_v53 = vsel %vm1254_vm4, %v1251_v50, 0.0 }
 0x4cd   :  { %1271 = vadd.xlane.f32.xlu0 %v1270_v53  ;;  %v1267_v54 = vsel %vm1254_vm4, %v1246_v52, 0.0 }
 0x4ce   :  { %1268 = vadd.xlane.f32.xlu1 %v1267_v54 }
 0x522   :  { %v1260_v55 = vpop.xlane.xlu0 %1259 }
 0x523   :  { %v1275_v56 = vmul.f32 0.015625, %v1260_v55  ;;  %v1257_v57 = vpop.xlane.xlu1 %1256 }
 0x524   :  { %v1274_v58 = vmul.f32 0.015625, %v1257_v57 }
 0x525   :  { %v1281_v59 = vsub.f32 %v1231_v35, %v1275_v56 }
 0x526   :  { %v1280_v60 = vsub.f32 %v1226_v37, %v1274_v58 }
 0x527   :  { %v1287_v62 = vmul.f32 %v1281_v59, %v1281_v59 }
 0x528   :  { %v1286_v63 = vmul.f32 %v1280_v60, %v1280_v60 }
 0x529   :  { %v1295_v0 = vsel %vm1254_vm4, %v1287_v62, 0.0 }
 0x52a   :  { %1296 = vadd.xlane.f32.xlu0 %v1295_v0  ;;  %v1292_v1 = vsel %vm1254_vm4, %v1286_v63, 0.0 }
 0x52b   :  { %1293 = vadd.xlane.f32.xlu1 %v1292_v1 }
 0x53e   :  { %v1266_v2 = vpop.xlane.xlu0 %1265 }
 0x53f   :  { %v1277_v39 = vmul.f32 0.015625, %v1266_v2  ;;  %v1263_v3 = vpop.xlane.xlu1 %1262 }
 0x540   :  { %v1276_v4 = vmul.f32 0.015625, %v1263_v3 }
 0x541   :  { %v1283_v43 = vsub.f32 %v1241_v42, %v1277_v39 }
 0x542   :  { %v1282_v5 = vsub.f32 %v1236_v45, %v1276_v4 }
 0x543   :  { %v1289_v10 = vmul.f32 %v1283_v43, %v1283_v43 }
 0x544   :  { %v1288_v6 = vmul.f32 %v1282_v5, %v1282_v5 }
 0x545   :  { %v1301_v7 = vsel %vm1254_vm4, %v1289_v10, 0.0 }
 0x546   :  { %1302 = vadd.xlane.f32.xlu0 %v1301_v7  ;;  %v1298_v11 = vsel %vm1254_vm4, %v1288_v6, 0.0 }
 0x547   :  { %1299 = vadd.xlane.f32.xlu1 %v1298_v11 }
 0x55a   :  { %v1272_v8 = vpop.xlane.xlu0 %1271 }
 0x55b   :  { %v1279_v9 = vmul.f32 0.015625, %v1272_v8  ;;  %v1269_v12 = vpop.xlane.xlu1 %1268 }
 0x55c   :  { %v1278_v13 = vmul.f32 0.015625, %v1269_v12 }
 0x55d   :  { %v1285_v14 = vsub.f32 %v1251_v50, %v1279_v9 }
 0x55e   :  { %v1284_v15 = vsub.f32 %v1246_v52, %v1278_v13 }
 0x55f   :  { %v1291_v16 = vmul.f32 %v1285_v14, %v1285_v14 }
 0x560   :  { %v1290_v17 = vmul.f32 %v1284_v15, %v1284_v15 }
 0x561   :  { %v1307_v18 = vsel %vm1254_vm4, %v1291_v16, 0.0 }
 0x562   :  { %1308 = vadd.xlane.f32.xlu0 %v1307_v18  ;;  %v1304_v19 = vsel %vm1254_vm4, %v1290_v17, 0.0 }
 0x563   :  { %1305 = vadd.xlane.f32.xlu1 %v1304_v19 }
 0x5b7   :  { %v1297_v20 = vpop.xlane.xlu0 %1296 }
 0x5b8   :  { %v1311_v61 = vmul.f32 0.015625, %v1297_v20  ;;  %v1294_v21 = vpop.xlane.xlu1 %1293 }
 0x5b9   :  { %v1310_v22 = vmul.f32 0.015625, %v1294_v21 }
 0x5ba   :  { %v1317_v47 = vadd.f32 1e-05, %v1311_v61 }
 0x5bb   :  { %v1316_v23 = vadd.f32 1e-05, %v1310_v22 }
 0x5bc   :  { %1655 = vrsqrt.f32 %v1317_v47 }
 0x5bd   :  { %1657 = vrsqrt.f32 %v1316_v23 }
 0x5c6   :  { %v1656_v24 = vpop.eup %1655 }
 0x5c7   :  { %v1658_v26 = vpop.eup %1657  ;;  %v1329_v27 = vmul.f32 %v1656_v24, %v1281_v59 }
 0x5c8   :  { %v1328_v29 = vmul.f32 %v1658_v26, %v1280_v60 }
 0x5c9   :  { %v1341_v30 = vmul.f32 %v1434_v25, %v1329_v27 }
 0x5ca   :  { %v1340_v31 = vmul.f32 %v1434_v25, %v1328_v29 }
 0x5cb   :  { %v1353_v32 = vadd.f32 %v1435_v28, %v1341_v30 }
 0x5cc   :  { %v1352_v33 = vadd.f32 %v1435_v28, %v1340_v31 }
 0x5cd   :  { %1359 = vst.msk [vmem:[#allocation4 + $0x8] sm:$0xff] %vm1254_vm4, %v1353_v32 }
 0x5ce   :  { %1358 = vst.msk [vmem:[#allocation4] sm:$0xff] %vm1254_vm4, %v1352_v33 }
 0x5d3   :  { %v1303_v34 = vpop.xlane.xlu0 %1302 }
 0x5d4   :  { %v1313_v35 = vmul.f32 0.015625, %v1303_v34  ;;  %v1300_v36 = vpop.xlane.xlu1 %1299 }
 0x5d5   :  { %v1312_v37 = vmul.f32 0.015625, %v1300_v36 }
 0x5d6   :  { %v1319_v38 = vadd.f32 1e-05, %v1313_v35 }
 0x5d7   :  { %v1318_v40 = vadd.f32 1e-05, %v1312_v37 }
 0x5d8   :  { %1659 = vrsqrt.f32 %v1319_v38 }
 0x5d9   :  { %1661 = vrsqrt.f32 %v1318_v40 }
 0x5e2   :  { %v1660_v41 = vpop.eup %1659 }
 0x5e3   :  { %v1662_v42 = vpop.eup %1661  ;;  %v1331_v44 = vmul.f32 %v1660_v41, %v1283_v43 }
 0x5e4   :  { %v1330_v45 = vmul.f32 %v1662_v42, %v1282_v5 }
 0x5e5   :  { %v1343_v46 = vmul.f32 %v1434_v25, %v1331_v44 }
 0x5e6   :  { %v1342_v48 = vmul.f32 %v1434_v25, %v1330_v45 }
 0x5e7   :  { %v1355_v49 = vadd.f32 %v1435_v28, %v1343_v46 }
 0x5e8   :  { %v1354_v50 = vadd.f32 %v1435_v28, %v1342_v48 }
 0x5e9   :  { %1361 = vst.msk [vmem:[#allocation4 + $0x18] sm:$0xff] %vm1254_vm4, %v1355_v49 }
 0x5ea   :  { %1360 = vst.msk [vmem:[#allocation4 + $0x10] sm:$0xff] %vm1254_vm4, %v1354_v50 }
 0x5ef   :  { %v1309_v51 = vpop.xlane.xlu0 %1308 }
 0x5f0   :  { %v1315_v52 = vmul.f32 0.015625, %v1309_v51  ;;  %v1306_v53 = vpop.xlane.xlu1 %1305 }
 0x5f1   :  { %v1314_v54 = vmul.f32 0.015625, %v1306_v53 }
 0x5f2   :  { %v1321_v55 = vadd.f32 1e-05, %v1315_v52 }
 0x5f3   :  { %v1320_v56 = vadd.f32 1e-05, %v1314_v54 }
 0x5f4   :  { %1663 = vrsqrt.f32 %v1321_v55 }
 0x5f5   :  { %1665 = vrsqrt.f32 %v1320_v56 }
 0x5fe   :  { %v1664_v57 = vpop.eup %1663 }
 0x5ff   :  { %v1666_v58 = vpop.eup %1665  ;;  %v1333_v59 = vmul.f32 %v1664_v57, %v1285_v14 }
 0x600   :  { %v1332_v60 = vmul.f32 %v1666_v58, %v1284_v15 }
 0x601   :  { %v1345_v62 = vmul.f32 %v1434_v25, %v1333_v59 }
 0x602   :  { %v1344_v63 = vmul.f32 %v1434_v25, %v1332_v60 }
 0x603   :  { %v1357_v0 = vadd.f32 %v1435_v28, %v1345_v62 }
 0x604   :  { %v1356_v1 = vadd.f32 %v1435_v28, %v1344_v63 }
 0x605   :  { %1363 = vst.msk [vmem:[#allocation4 + $0x28] sm:$0xff] %vm1254_vm4, %v1357_v0 }
 0x606   :  { %1362 = vst.msk [vmem:[#allocation4 + $0x20] sm:$0xff] %vm1254_vm4, %v1356_v1 }
 0x607   :  { %1678 = shalt.err (!%p1675_p4)
}
 0x608   :  { %s1679_s13 = scalar_lea.hbm %s2244_s5, 768 }
 0x609   :  { %p1680_p5 = scmp.ne.s32.totalorder %s2244_s5, %s1679_s13  ;;  %p1683_p6 = scmp.lt.u32.totalorder %s1679_s13, %s2244_s5 }
 0x60b   :  { %p1685_p7 = pnand %p1683_p6, %p1680_p5 }
 0x60d   :  { %1688 = shalt.err (!%p1685_p7)
}
 0x60e   :  { %s1701_s17 = smov 128   ;;  %s1702_s18 = smov 8  }
 0x60f   :  { %1375 = dma.vmem_to_hbm [thread:$0]  %s1370_s10, 768, %s2244_s5, [#allocation5], %s1701_s17, %s1701_s17, %s1702_s18  }
 0x610   :  { %1689 = dma.done.wait [#allocation5], 768  }
 0x611   :  { %1690 = vsyncadd [#allocation5], 4294966528 }
 0x612   :  { %1379 = vsyncpa [#allocation5], 1 }

</bundles_post_ra>
